<compile_context>
chip_gen: v5e
topology: v5e:2x2
jax: 0.10.0
libtpu: 0.0.40
codegen_flags: <defaults>
</compile_context>

<pallas_src>
import functools

import numpy as np
import jax
import jax.numpy as jnp
from jax.experimental import pallas as pl
from jax.experimental.pallas import tpu as pltpu


def _silu(x):
    return x * jax.nn.sigmoid(x)


def _round_up(x, m):
    return ((x + m - 1) // m) * m


def egcl_kernel(
    rows_ref, h_row_ref, h_col_ref, h_ref, bat_ref,
    ew1s_ref, ew1t_ref, eb1_ref, ew2_ref, eb2_ref,
    nw1h_ref, nw1a_ref, nb1_ref, nw2_ref, nb2_ref,
    h_out_ref, h_scatter_ref,
    agg_ref,
):
    e = pl.program_id(0)
    mxu = ew2_ref.dtype          # MXU operand dtype (bf16 fast path or f32 exact)

    @pl.when(e == 0)
    def _init():
        agg_ref[...] = jnp.zeros_like(agg_ref)

    # ---- edge_model on this edge tile:
    # cat([h_row, h_col, radial]) @ W1 split into two matmuls; radial rides as
    # the last real column of h_row (its weight row is stacked under ew1_src),
    # so no separate lane-padded radial stream / VPU outer product is needed.
    m = (jnp.dot(h_row_ref[...], ew1s_ref[...], preferred_element_type=jnp.float32)
         + jnp.dot(h_col_ref[...], ew1t_ref[...], preferred_element_type=jnp.float32)
         + eb1_ref[...])
    m = _silu(m)
    m = _silu(jnp.dot(m.astype(mxu), ew2_ref[...],
                      preferred_element_type=jnp.float32) + eb2_ref[...])

    # ---- unsorted_segment_sum(edges -> nodes): per-tile one-hot built in
    # registers (never materialized in HBM).  Both MXU operands are cast to the
    # fast dtype (one-hot is 0/1 -> exact); accumulation stays f32 in the
    # persistent (N, H) scratch.  Padded edges carry row = -1 and match no node.
    rows = rows_ref[...]                                              # (1, tE) int32
    node_ids = jax.lax.broadcasted_iota(
        jnp.int32, (agg_ref.shape[0], rows.shape[1]), 0)              # (N, tE)
    onehot = (node_ids == rows).astype(mxu)                           # (N, tE)
    agg_ref[...] += jnp.dot(onehot, m.astype(mxu),
                            preferred_element_type=jnp.float32)

    # ---- last edge tile: node_model (Linear, SiLU, Linear, residual) and the
    # per-graph batch scatter, on resident data, lane-dense outputs.
    @pl.when(e == pl.num_programs(0) - 1)
    def _finish():
        h = h_ref[...]                                                # f32 resident
        o = (jnp.dot(h.astype(mxu), nw1h_ref[...],
                     preferred_element_type=jnp.float32)
             + jnp.dot(agg_ref[...].astype(mxu), nw1a_ref[...],
                       preferred_element_type=jnp.float32)
             + nb1_ref[...])
        o = _silu(o)
        o = jnp.dot(o.astype(mxu), nw2_ref[...],
                    preferred_element_type=jnp.float32) + nb2_ref[...]
        h_out = (h + o).astype(h_out_ref.dtype)                       # residual
        h_out_ref[...] = h_out
        # scatter(h, batch, reduce='add') as a small (G x N) one-hot matmul.
        h_scatter_ref[...] = jnp.dot(
            bat_ref[...], h_out.astype(bat_ref.dtype),
            preferred_element_type=jnp.float32).astype(h_scatter_ref.dtype)


def _derive_tiling(E, N_pad, F_pad, F_row_pad, H_pad, OUT_pad, G_pad, w_item,
                   edge_tile):
    """Pick the edge-tile size and vmem limit from an accounted VMEM budget."""
    try:
        phys = int(pltpu.get_tpu_info().vmem_capacity_bytes)
    except Exception:
        phys = 64 * 2 ** 20                       # conservative (v7x per-TC) fallback
    budget = int(0.85 * phys)                     # headroom for compiler scratch

    # Resident inputs/outputs (constant index_maps): count x2 for Pallas'
    # default double-buffering; agg scratch is a single buffer.
    resident = 2 * (
        N_pad * F_pad * 4                                     # h (f32)
        + G_pad * N_pad * w_item                              # batch one-hot
        + (F_row_pad + 2 * F_pad) * H_pad * w_item            # ew1_src+rad, ew1_tgt, nw1_h
        + 2 * H_pad * H_pad * w_item                          # ew2, nw1_agg
        + H_pad * OUT_pad * w_item                            # nw2
        + (4 * H_pad + OUT_pad) * 4                           # biases (f32)
        + N_pad * OUT_pad * 4 + G_pad * OUT_pad * 4)          # outputs
    resident += N_pad * H_pad * 4                             # agg accumulator

    # Per-edge cost: streamed blocks (double-buffered) + the one-hot / iota
    # intermediates + (tE, H) message temporaries.
    per_edge = (2 * ((F_row_pad + F_pad) * w_item + 8 * 4)
                + N_pad * (w_item + 4)
                + 3 * H_pad * 4)

    cap = 2048 if phys > 96 * 2 ** 20 else 512    # bigger tiles on 128 MiB parts
    if edge_tile is not None:
        cap = max(128, _round_up(int(edge_tile), 128))
    te = (max(budget - resident, 0) // max(per_edge, 1)) // 128 * 128
    te = int(max(128, min(cap, te)))
    te = min(te, _round_up(max(E, 1), 128))
    return te, budget


@functools.partial(jax.jit,
                   static_argnames=("num_graphs", "tE", "vmem_limit", "mxu_dtype"))
def _e_gcl_forward(params, h, edge_index, coord, batch, num_graphs, tE,
                   vmem_limit, mxu_dtype):
    row, col = edge_index
    N, F = h.shape
    E = row.shape[0]
    H = params["ew2"].shape[0]
    OUT = params["nw2"].shape[1]
    assert OUT == F, "residual=True requires output_nf == input_nf"

    f32 = jnp.float32
    F_pad, H_pad, OUT_pad = (_round_up(d, 128) for d in (F, H, OUT))
    F_row_pad = _round_up(F + 1, 128)             # radial folded into h_row stream
    N_pad = _round_up(N, 8)
    G_pad = _round_up(num_graphs, 8)
    E_pad = _round_up(E, tE)
    num_tiles = E_pad // tE

    # ---- glue in plain JAX: radial, endpoint gathers, padding ----
    coord_diff = coord[row] - coord[col]
    radial = jnp.sum(coord_diff * coord_diff, axis=-1, keepdims=True)      # (E, 1)
    h_row_aug = jnp.concatenate([h[row], radial.astype(h.dtype)], axis=1)  # (E, F+1)
    h_row = jnp.pad(h_row_aug,
                    ((0, E_pad - E), (0, F_row_pad - (F + 1)))).astype(mxu_dtype)
    h_col = jnp.pad(h[col], ((0, E_pad - E), (0, F_pad - F))).astype(mxu_dtype)
    rows_pad = jnp.pad(row.astype(jnp.int32), (0, E_pad - E),
                       constant_values=-1)[None, :]                        # (1, E_pad)
    h_pad = jnp.pad(h, ((0, N_pad - N), (0, F_pad - F)))                   # f32 resident
    bat_mat = (batch[None, :] == jnp.arange(G_pad, dtype=batch.dtype)[:, None]
               ).astype(mxu_dtype)                                         # (G_pad, N)
    bat_mat = jnp.pad(bat_mat, ((0, 0), (0, N_pad - N)))                   # (G_pad, N_pad)

    def pad_w(w, r, c, dt):
        return jnp.pad(w, ((0, r - w.shape[0]), (0, c - w.shape[1]))).astype(dt)

    ew1_src_aug = jnp.concatenate([params["ew1_src"], params["ew1_rad"]], axis=0)
    pw = dict(
        ew1s=pad_w(ew1_src_aug, F_row_pad, H_pad, mxu_dtype),
        ew1t=pad_w(params["ew1_tgt"], F_pad, H_pad, mxu_dtype),
        eb1=pad_w(params["eb1"], 1, H_pad, f32),
        ew2=pad_w(params["ew2"], H_pad, H_pad, mxu_dtype),
        eb2=pad_w(params["eb2"], 1, H_pad, f32),
        nw1h=pad_w(params["nw1_h"], F_pad, H_pad, mxu_dtype),
        nw1a=pad_w(params["nw1_agg"], H_pad, H_pad, mxu_dtype),
        nb1=pad_w(params["nb1"], 1, H_pad, f32),
        nw2=pad_w(params["nw2"], H_pad, OUT_pad, mxu_dtype),
        nb2=pad_w(params["nb2"], 1, OUT_pad, f32),
    )

    inputs = (rows_pad, h_row, h_col, h_pad, bat_mat,
              pw["ew1s"], pw["ew1t"], pw["eb1"], pw["ew2"], pw["eb2"],
              pw["nw1h"], pw["nw1a"], pw["nb1"], pw["nw2"], pw["nb2"])

    def resident(shape):
        return pl.BlockSpec(shape, lambda e: (0, 0))   # constant index_map -> VMEM-resident

    in_specs = [
        pl.BlockSpec((1, tE), lambda e: (0, e)),            # row indices (streamed)
        pl.BlockSpec((tE, F_row_pad), lambda e: (e, 0)),    # h[row] (+radial) tile
        pl.BlockSpec((tE, F_pad), lambda e: (e, 0)),        # h[col] tile
        resident((N_pad, F_pad)),                           # h
        resident((G_pad, N_pad)),                           # batch one-hot
        resident((F_row_pad, H_pad)), resident((F_pad, H_pad)), resident((1, H_pad)),
        resident((H_pad, H_pad)), resident((1, H_pad)),
        resident((F_pad, H_pad)), resident((H_pad, H_pad)), resident((1, H_pad)),
        resident((H_pad, OUT_pad)), resident((1, OUT_pad)),
    ]
    out_specs = (
        pl.BlockSpec((N_pad, OUT_pad), lambda e: (0, 0)),   # h_out (lane dense)
        pl.BlockSpec((G_pad, OUT_pad), lambda e: (0, 0)),   # h_scatter (lane dense)
    )

    # Residual layer: output_nf == input_nf, so h can share HBM with h_out.
    io_aliases = {3: 0} if F_pad == OUT_pad else {}

    h_out_pad, h_scatter_pad = pl.pallas_call(
        egcl_kernel,
        out_shape=(jax.ShapeDtypeStruct((N_pad, OUT_pad), h.dtype),
                   jax.ShapeDtypeStruct((G_pad, OUT_pad), h.dtype)),
        grid_spec=pltpu.PrefetchScalarGridSpec(
            num_scalar_prefetch=0,
            grid=(num_tiles,),
            in_specs=in_specs,
            out_specs=out_specs,
            scratch_shapes=[pltpu.VMEM((N_pad, H_pad), jnp.float32)],  # agg accumulator
        ),
        compiler_params=pltpu.CompilerParams(
            dimension_semantics=("arbitrary",),             # edge axis is a reduction
            vmem_limit_bytes=int(vmem_limit),
        ),
        input_output_aliases=io_aliases,
    )(*inputs)

    # add_edge_feats was None -> passed through as None (matches PyTorch return).
    return h_out_pad[:N, :OUT], None, h_scatter_pad[:num_graphs, :OUT]


def e_gcl_forward(params, h, edge_index, coord, batch, num_graphs,
                  edge_tile=None, mxu_dtype=None):
    """Pallas-backed E_GCL.forward. Returns (h_out, add_edge_feats, h_scatter).

    mxu_dtype default bf16: streamed operands, matrix weights and the 0/1
    one-hots feed the MXU in bf16 with f32 accumulation (fast path on
    v5e/v6e/v7x).  Pass jnp.float32 for exact arithmetic.
    """
    if mxu_dtype is None:
        mxu_dtype = jnp.bfloat16
    mxu_dtype = jnp.dtype(mxu_dtype)

    row, col = edge_index
    N, F = h.shape
    E = int(row.shape[0])
    H = int(params["ew2"].shape[0])
    OUT = int(params["nw2"].shape[1])
    F_pad, H_pad, OUT_pad = (_round_up(d, 128) for d in (F, H, OUT))
    F_row_pad = _round_up(F + 1, 128)
    N_pad = _round_up(N, 8)
    G_pad = _round_up(int(num_graphs), 8)

    tE, vmem_limit = _derive_tiling(E, N_pad, F_pad, F_row_pad, H_pad, OUT_pad,
                                    G_pad, mxu_dtype.itemsize, edge_tile)
    return _e_gcl_forward(params, h, (row, col), coord, batch,
                          int(num_graphs), int(tE), int(vmem_limit), mxu_dtype)


def init_params(key, input_nf, hidden_nf, output_nf):
    """Deterministic nn.Linear-style init: U(-1/sqrt(fan_in), 1/sqrt(fan_in))."""
    def linear(k, fan_in, fan_out):
        kw, kb = jax.random.split(k)
        bound = 1.0 / np.sqrt(fan_in)
        w = jax.random.uniform(kw, (fan_in, fan_out), jnp.float32, -bound, bound)
        b = jax.random.uniform(kb, (1, fan_out), jnp.float32, -bound, bound)
        return w, b

    k = jax.random.split(key, 4)
    # edge_mlp: Linear(2F+1 -> H), SiLU, Linear(H -> H), SiLU
    ew1, eb1 = linear(k[0], 2 * input_nf + 1, hidden_nf)
    ew2, eb2 = linear(k[1], hidden_nf, hidden_nf)
    # node_mlp: Linear(H+F -> H), SiLU, Linear(H -> out)
    nw1, nb1 = linear(k[2], hidden_nf + input_nf, hidden_nf)
    nw2, nb2 = linear(k[3], hidden_nf, output_nf)

    return {
        "ew1_src": ew1[:input_nf],                 # (F, H)
        "ew1_tgt": ew1[input_nf:2 * input_nf],     # (F, H)
        "ew1_rad": ew1[2 * input_nf:],             # (1, H)
        "eb1": eb1, "ew2": ew2, "eb2": eb2,
        "nw1_h": nw1[:input_nf],                   # (F, H)
        "nw1_agg": nw1[input_nf:],                 # (H, H)
        "nb1": nb1, "nw2": nw2, "nb2": nb2,
    }


def e_gcl_reference(params, h, edge_index, coord, batch, num_graphs):
    """Pure-JAX reference mirroring the PyTorch forward (for verification)."""
    row, col = edge_index
    coord_diff = coord[row] - coord[col]
    radial = jnp.sum(coord_diff ** 2, axis=1, keepdims=True)
    edge_in = jnp.concatenate([h[row], h[col], radial], axis=1)
    ew1 = jnp.concatenate([params["ew1_src"], params["ew1_tgt"], params["ew1_rad"]], axis=0)
    m = jax.nn.silu(edge_in @ ew1 + params["eb1"])
    m = jax.nn.silu(m @ params["ew2"] + params["eb2"])
    agg = jnp.zeros((h.shape[0], m.shape[1]), m.dtype).at[row].add(m)
    node_in = jnp.concatenate([h, agg], axis=1)
    nw1 = jnp.concatenate([params["nw1_h"], params["nw1_agg"]], axis=0)
    o = jax.nn.silu(node_in @ nw1 + params["nb1"])
    o = o @ params["nw2"] + params["nb2"]
    h_out = h + o
    h_scatter = jnp.zeros((num_graphs, h_out.shape[1]), h_out.dtype).at[batch].add(h_out)
    return h_out, h_scatter


if __name__ == "__main__":
    key = jax.random.PRNGKey(0)
    # nodes, in_nf, hidden, out_nf, coord dim, graphs, edges
    N, F, H, OUT, C, G, E = 16, 16, 32, 16, 3, 2, 160

    keys = jax.random.split(key, 6)
    h = jax.random.normal(keys[0], (N, F), jnp.float32)
    coord = jax.random.normal(keys[1], (N, C), jnp.float32)

    # Edges kept within each graph (nodes 0..7 -> graph 0, nodes 8..15 -> graph 1).
    row = jax.random.randint(keys[2], (E,), 0, 8).astype(jnp.int32)
    col = jax.random.randint(keys[3], (E,), 0, 8).astype(jnp.int32)
    row = row.at[E // 2:].add(8)
    col = col.at[E // 2:].add(8)
    batch = jnp.repeat(jnp.arange(G, dtype=jnp.int32), N // G)

    params = init_params(keys[4], F, H, OUT)

    # Exact f32 path; edge_tile=128 -> 2 edge tiles (exercises accumulation).
    h_out, edge_feats, h_scatter = e_gcl_forward(
        params, h, (row, col), coord, batch, G, edge_tile=128, mxu_dtype=jnp.float32)
    jax.block_until_ready((h_out, h_scatter))

    h_out_ref, h_scatter_ref = e_gcl_reference(params, h, (row, col), coord, batch, G)
    assert edge_feats is None
    assert jnp.allclose(h_out, h_out_ref, atol=1e-4, rtol=1e-4)
    assert jnp.allclose(h_scatter, h_scatter_ref, atol=1e-4, rtol=1e-4)

    # Default bf16 MXU-operand path (f32 accumulation) -- loose sanity check.
    h_out_bf, _, h_sc_bf = e_gcl_forward(
        params, h, (row, col), coord, batch, G, edge_tile=128)
    jax.block_until_ready((h_out_bf, h_sc_bf))
    assert bool(jnp.all(jnp.isfinite(h_out_bf))) and bool(jnp.all(jnp.isfinite(h_sc_bf)))
    scale = 1.0 + float(jnp.max(jnp.abs(h_out_ref)))
    assert float(jnp.max(jnp.abs(h_out_bf.astype(jnp.float32) - h_out_ref))) / scale < 0.05

    print("KERNEL_OK")
</pallas_src>

<mosaic_0001>
module attributes {stable_mosaic.version = 11 : i64} {
  func.func @egcl_kernel(%arg0: i32, %arg1: memref<1x128xi32, #tpu.memory_space<vmem>>, %arg2: memref<128x128xf32, #tpu.memory_space<vmem>>, %arg3: memref<128x128xf32, #tpu.memory_space<vmem>>, %arg4: memref<16x128xf32, #tpu.memory_space<vmem>>, %arg5: memref<8x16xf32, #tpu.memory_space<vmem>>, %arg6: memref<128x128xf32, #tpu.memory_space<vmem>>, %arg7: memref<128x128xf32, #tpu.memory_space<vmem>>, %arg8: memref<1x128xf32, #tpu.memory_space<vmem>>, %arg9: memref<128x128xf32, #tpu.memory_space<vmem>>, %arg10: memref<1x128xf32, #tpu.memory_space<vmem>>, %arg11: memref<128x128xf32, #tpu.memory_space<vmem>>, %arg12: memref<128x128xf32, #tpu.memory_space<vmem>>, %arg13: memref<1x128xf32, #tpu.memory_space<vmem>>, %arg14: memref<128x128xf32, #tpu.memory_space<vmem>>, %arg15: memref<1x128xf32, #tpu.memory_space<vmem>>, %arg16: memref<16x128xf32, #tpu.memory_space<vmem>>, %arg17: memref<8x128xf32, #tpu.memory_space<vmem>>, %arg18: memref<16x128xf32, #tpu.memory_space<vmem>>) attributes {dimension_semantics = [#tpu.dimension_semantics<arbitrary>], iteration_bounds = array<i64: 2>, scalar_prefetch = 0 : i64, scratch_operands = 1 : i64, tpu.core_type = #tpu.core_type<tc>, window_params = [{transform_indices = @transform_0, window_bounds = array<i64: 1, 128>}, {transform_indices = @transform_1, window_bounds = array<i64: 128, 128>}, {transform_indices = @transform_2, window_bounds = array<i64: 128, 128>}, {pipeline_mode = #tpu.pipeline_mode<synchronous>, transform_indices = @transform_3, window_bounds = array<i64: 16, 128>}, {pipeline_mode = #tpu.pipeline_mode<synchronous>, transform_indices = @transform_4, window_bounds = array<i64: 8, 16>}, {pipeline_mode = #tpu.pipeline_mode<synchronous>, transform_indices = @transform_5, window_bounds = array<i64: 128, 128>}, {pipeline_mode = #tpu.pipeline_mode<synchronous>, transform_indices = @transform_6, window_bounds = array<i64: 128, 128>}, {pipeline_mode = #tpu.pipeline_mode<synchronous>, transform_indices = @transform_7, window_bounds = array<i64: 1, 128>}, {pipeline_mode = #tpu.pipeline_mode<synchronous>, transform_indices = @transform_8, window_bounds = array<i64: 128, 128>}, {pipeline_mode = #tpu.pipeline_mode<synchronous>, transform_indices = @transform_9, window_bounds = array<i64: 1, 128>}, {pipeline_mode = #tpu.pipeline_mode<synchronous>, transform_indices = @transform_10, window_bounds = array<i64: 128, 128>}, {pipeline_mode = #tpu.pipeline_mode<synchronous>, transform_indices = @transform_11, window_bounds = array<i64: 128, 128>}, {pipeline_mode = #tpu.pipeline_mode<synchronous>, transform_indices = @transform_12, window_bounds = array<i64: 1, 128>}, {pipeline_mode = #tpu.pipeline_mode<synchronous>, transform_indices = @transform_13, window_bounds = array<i64: 128, 128>}, {pipeline_mode = #tpu.pipeline_mode<synchronous>, transform_indices = @transform_14, window_bounds = array<i64: 1, 128>}, {pipeline_mode = #tpu.pipeline_mode<synchronous>, transform_indices = @transform_15, window_bounds = array<i64: 16, 128>}, {pipeline_mode = #tpu.pipeline_mode<synchronous>, transform_indices = @transform_16, window_bounds = array<i64: 8, 128>}]} {
    %c0_i32 = arith.constant 0 : i32
    %0 = arith.cmpi eq, %arg0, %c0_i32 : i32
    %1 = arith.extui %0 : i1 to i32
    %c0_i32_0 = arith.constant 0 : i32
    %2 = arith.cmpi ne, %1, %c0_i32_0 : i32
    scf.if %2 {
      %cst_26 = arith.constant 0.000000e+00 : f32
      %43 = vector.broadcast %cst_26 : f32 to vector<16x128xf32>
      %c0_27 = arith.constant 0 : index
      %c0_28 = arith.constant 0 : index
      %44 = vector.load %arg18[%c0_27, %c0_28] : memref<16x128xf32, #tpu.memory_space<vmem>>, vector<16x128xf32>
      tpu.vector_store %arg18[%c0_27, %c0_28], %43 {strides = array<i32>} : memref<16x128xf32, #tpu.memory_space<vmem>>, vector<16x128xf32>,
    } else {
    }
    %c0 = arith.constant 0 : index
    %c0_1 = arith.constant 0 : index
    %3 = vector.load %arg2[%c0, %c0_1] : memref<128x128xf32, #tpu.memory_space<vmem>>, vector<128x128xf32>
    %c0_2 = arith.constant 0 : index
    %c0_3 = arith.constant 0 : index
    %4 = vector.load %arg6[%c0_2, %c0_3] : memref<128x128xf32, #tpu.memory_space<vmem>>, vector<128x128xf32>
    %cst = arith.constant dense<0.000000e+00> : vector<128x128xf32>
    %5 = tpu.matmul %3, %4, %cst {dimension_numbers = #tpu.dot_dimension_numbers<[1], [0], [0], [1], [0, 0, 1, 1], [], []>} : vector<128x128xf32>, vector<128x128xf32>, vector<128x128xf32> -> vector<128x128xf32>
    %c0_4 = arith.constant 0 : index
    %c0_5 = arith.constant 0 : index
    %6 = vector.load %arg3[%c0_4, %c0_5] : memref<128x128xf32, #tpu.memory_space<vmem>>, vector<128x128xf32>
    %c0_6 = arith.constant 0 : index
    %c0_7 = arith.constant 0 : index
    %7 = vector.load %arg7[%c0_6, %c0_7] : memref<128x128xf32, #tpu.memory_space<vmem>>, vector<128x128xf32>
    %cst_8 = arith.constant dense<0.000000e+00> : vector<128x128xf32>
    %8 = tpu.matmul %6, %7, %cst_8 {dimension_numbers = #tpu.dot_dimension_numbers<[1], [0], [0], [1], [0, 0, 1, 1], [], []>} : vector<128x128xf32>, vector<128x128xf32>, vector<128x128xf32> -> vector<128x128xf32>
    %9 = arith.addf %5, %8 : vector<128x128xf32>
    %c0_9 = arith.constant 0 : index
    %c0_10 = arith.constant 0 : index
    %10 = vector.load %arg8[%c0_9, %c0_10] : memref<1x128xf32, #tpu.memory_space<vmem>>, vector<1x128xf32>
    %11 = vector.broadcast %10 : vector<1x128xf32> to vector<128x128xf32>
    %12 = arith.addf %9, %11 : vector<128x128xf32>
    %13 = arith.negf %12 : vector<128x128xf32>
    %14 = math.exp %13 : vector<128x128xf32>
    %cst_11 = arith.constant 1.000000e+00 : f32
    %15 = vector.broadcast %cst_11 : f32 to vector<128x128xf32>
    %16 = arith.addf %15, %14 : vector<128x128xf32>
    %17 = arith.divf %15, %16 : vector<128x128xf32>
    %18 = arith.mulf %12, %17 : vector<128x128xf32>
    %c0_12 = arith.constant 0 : index
    %c0_13 = arith.constant 0 : index
    %19 = vector.load %arg9[%c0_12, %c0_13] : memref<128x128xf32, #tpu.memory_space<vmem>>, vector<128x128xf32>
    %cst_14 = arith.constant dense<0.000000e+00> : vector<128x128xf32>
    %20 = tpu.matmul %18, %19, %cst_14 {dimension_numbers = #tpu.dot_dimension_numbers<[1], [0], [0], [1], [0, 0, 1, 1], [], []>} : vector<128x128xf32>, vector<128x128xf32>, vector<128x128xf32> -> vector<128x128xf32>
    %c0_15 = arith.constant 0 : index
    %c0_16 = arith.constant 0 : index
    %21 = vector.load %arg10[%c0_15, %c0_16] : memref<1x128xf32, #tpu.memory_space<vmem>>, vector<1x128xf32>
    %22 = vector.broadcast %21 : vector<1x128xf32> to vector<128x128xf32>
    %23 = arith.addf %20, %22 : vector<128x128xf32>
    %24 = arith.negf %23 : vector<128x128xf32>
    %25 = math.exp %24 : vector<128x128xf32>
    %cst_17 = arith.constant 1.000000e+00 : f32
    %26 = vector.broadcast %cst_17 : f32 to vector<128x128xf32>
    %27 = arith.addf %26, %25 : vector<128x128xf32>
    %28 = arith.divf %26, %27 : vector<128x128xf32>
    %29 = arith.mulf %23, %28 : vector<128x128xf32>
    %c0_18 = arith.constant 0 : index
    %c0_19 = arith.constant 0 : index
    %30 = vector.load %arg1[%c0_18, %c0_19] : memref<1x128xi32, #tpu.memory_space<vmem>>, vector<1x128xi32>
    %31 = tpu.iota {dimensions = array<i32: 0>} : vector<16x128xi32>
    %32 = vector.broadcast %30 : vector<1x128xi32> to vector<16x128xi32>
    %33 = arith.cmpi eq, %31, %32 : vector<16x128xi32>
    %34 = arith.extui %33 : vector<16x128xi1> to vector<16x128xi32>
    %35 = arith.sitofp %34 : vector<16x128xi32> to vector<16x128xf32>
    %c0_20 = arith.constant 0 : index
    %c0_21 = arith.constant 0 : index
    %36 = vector.load %arg18[%c0_20, %c0_21] : memref<16x128xf32, #tpu.memory_space<vmem>>, vector<16x128xf32>
    %cst_22 = arith.constant dense<0.000000e+00> : vector<16x128xf32>
    %37 = tpu.matmul %35, %29, %cst_22 {dimension_numbers = #tpu.dot_dimension_numbers<[1], [0], [0], [1], [0, 0, 1, 1], [], []>} : vector<16x128xf32>, vector<128x128xf32>, vector<16x128xf32> -> vector<16x128xf32>
    %38 = arith.addf %36, %37 : vector<16x128xf32>
    %c0_23 = arith.constant 0 : index
    %c0_24 = arith.constant 0 : index
    %39 = vector.load %arg18[%c0_23, %c0_24] : memref<16x128xf32, #tpu.memory_space<vmem>>, vector<16x128xf32>
    tpu.vector_store %arg18[%c0_23, %c0_24], %38 {strides = array<i32>} : memref<16x128xf32, #tpu.memory_space<vmem>>, vector<16x128xf32>,
    %c1_i32 = arith.constant 1 : i32
    %40 = arith.cmpi eq, %arg0, %c1_i32 : i32
    %41 = arith.extui %40 : i1 to i32
    %c0_i32_25 = arith.constant 0 : i32
    %42 = arith.cmpi ne, %41, %c0_i32_25 : i32
    scf.if %42 {
      %c0_26 = arith.constant 0 : index
      %c0_27 = arith.constant 0 : index
      %43 = vector.load %arg4[%c0_26, %c0_27] : memref<16x128xf32, #tpu.memory_space<vmem>>, vector<16x128xf32>
      %c0_28 = arith.constant 0 : index
      %c0_29 = arith.constant 0 : index
      %44 = vector.load %arg11[%c0_28, %c0_29] : memref<128x128xf32, #tpu.memory_space<vmem>>, vector<128x128xf32>
      %cst_30 = arith.constant dense<0.000000e+00> : vector<16x128xf32>
      %45 = tpu.matmul %43, %44, %cst_30 {dimension_numbers = #tpu.dot_dimension_numbers<[1], [0], [0], [1], [0, 0, 1, 1], [], []>} : vector<16x128xf32>, vector<128x128xf32>, vector<16x128xf32> -> vector<16x128xf32>
      %c0_31 = arith.constant 0 : index
      %c0_32 = arith.constant 0 : index
      %46 = vector.load %arg18[%c0_31, %c0_32] : memref<16x128xf32, #tpu.memory_space<vmem>>, vector<16x128xf32>
      %c0_33 = arith.constant 0 : index
      %c0_34 = arith.constant 0 : index
      %47 = vector.load %arg12[%c0_33, %c0_34] : memref<128x128xf32, #tpu.memory_space<vmem>>, vector<128x128xf32>
      %cst_35 = arith.constant dense<0.000000e+00> : vector<16x128xf32>
      %48 = tpu.matmul %46, %47, %cst_35 {dimension_numbers = #tpu.dot_dimension_numbers<[1], [0], [0], [1], [0, 0, 1, 1], [], []>} : vector<16x128xf32>, vector<128x128xf32>, vector<16x128xf32> -> vector<16x128xf32>
      %49 = arith.addf %45, %48 : vector<16x128xf32>
      %c0_36 = arith.constant 0 : index
      %c0_37 = arith.constant 0 : index
      %50 = vector.load %arg13[%c0_36, %c0_37] : memref<1x128xf32, #tpu.memory_space<vmem>>, vector<1x128xf32>
      %51 = vector.broadcast %50 : vector<1x128xf32> to vector<16x128xf32>
      %52 = arith.addf %49, %51 : vector<16x128xf32>
      %53 = arith.negf %52 : vector<16x128xf32>
      %54 = math.exp %53 : vector<16x128xf32>
      %cst_38 = arith.constant 1.000000e+00 : f32
      %55 = vector.broadcast %cst_38 : f32 to vector<16x128xf32>
      %56 = arith.addf %55, %54 : vector<16x128xf32>
      %57 = arith.divf %55, %56 : vector<16x128xf32>
      %58 = arith.mulf %52, %57 : vector<16x128xf32>
      %c0_39 = arith.constant 0 : index
      %c0_40 = arith.constant 0 : index
      %59 = vector.load %arg14[%c0_39, %c0_40] : memref<128x128xf32, #tpu.memory_space<vmem>>, vector<128x128xf32>
      %cst_41 = arith.constant dense<0.000000e+00> : vector<16x128xf32>
      %60 = tpu.matmul %58, %59, %cst_41 {dimension_numbers = #tpu.dot_dimension_numbers<[1], [0], [0], [1], [0, 0, 1, 1], [], []>} : vector<16x128xf32>, vector<128x128xf32>, vector<16x128xf32> -> vector<16x128xf32>
      %c0_42 = arith.constant 0 : index
      %c0_43 = arith.constant 0 : index
      %61 = vector.load %arg15[%c0_42, %c0_43] : memref<1x128xf32, #tpu.memory_space<vmem>>, vector<1x128xf32>
      %62 = vector.broadcast %61 : vector<1x128xf32> to vector<16x128xf32>
      %63 = arith.addf %60, %62 : vector<16x128xf32>
      %64 = arith.addf %43, %63 : vector<16x128xf32>
      %c0_44 = arith.constant 0 : index
      %c0_45 = arith.constant 0 : index
      %65 = vector.load %arg16[%c0_44, %c0_45] : memref<16x128xf32, #tpu.memory_space<vmem>>, vector<16x128xf32>
      tpu.vector_store %arg16[%c0_44, %c0_45], %64 {strides = array<i32>} : memref<16x128xf32, #tpu.memory_space<vmem>>, vector<16x128xf32>,
      %c0_46 = arith.constant 0 : index
      %c0_47 = arith.constant 0 : index
      %66 = vector.load %arg5[%c0_46, %c0_47] : memref<8x16xf32, #tpu.memory_space<vmem>>, vector<8x16xf32>
      %cst_48 = arith.constant dense<0.000000e+00> : vector<8x128xf32>
      %67 = tpu.matmul %66, %64, %cst_48 {dimension_numbers = #tpu.dot_dimension_numbers<[1], [0], [0], [1], [0, 0, 1, 1], [], []>} : vector<8x16xf32>, vector<16x128xf32>, vector<8x128xf32> -> vector<8x128xf32>
      %c0_49 = arith.constant 0 : index
      %c0_50 = arith.constant 0 : index
      %68 = vector.load %arg17[%c0_49, %c0_50] : memref<8x128xf32, #tpu.memory_space<vmem>>, vector<8x128xf32>
      tpu.vector_store %arg17[%c0_49, %c0_50], %67 {strides = array<i32>} : memref<8x128xf32, #tpu.memory_space<vmem>>, vector<8x128xf32>,
    } else {
    }
    return
  }
  func.func @transform_0(%arg0: i32) -> (i32, i32) {
    %c0_i32 = arith.constant 0 : i32
    %c0_i32_0 = arith.constant 0 : i32
    return %c0_i32, %arg0 : i32, i32
  }
  func.func @transform_1(%arg0: i32) -> (i32, i32) {
    %c0_i32 = arith.constant 0 : i32
    %c0_i32_0 = arith.constant 0 : i32
    return %arg0, %c0_i32 : i32, i32
  }
  func.func @transform_2(%arg0: i32) -> (i32, i32) {
    %c0_i32 = arith.constant 0 : i32
    %c0_i32_0 = arith.constant 0 : i32
    return %arg0, %c0_i32 : i32, i32
  }
  func.func @transform_3(%arg0: i32) -> (i32, i32) {
    %c0_i32 = arith.constant 0 : i32
    %c0_i32_0 = arith.constant 0 : i32
    %c0_i32_1 = arith.constant 0 : i32
    return %c0_i32, %c0_i32_0 : i32, i32
  }
  func.func @transform_4(%arg0: i32) -> (i32, i32) {
    %c0_i32 = arith.constant 0 : i32
    %c0_i32_0 = arith.constant 0 : i32
    %c0_i32_1 = arith.constant 0 : i32
    return %c0_i32, %c0_i32_0 : i32, i32
  }
  func.func @transform_5(%arg0: i32) -> (i32, i32) {
    %c0_i32 = arith.constant 0 : i32
    %c0_i32_0 = arith.constant 0 : i32
    %c0_i32_1 = arith.constant 0 : i32
    return %c0_i32, %c0_i32_0 : i32, i32
  }
  func.func @transform_6(%arg0: i32) -> (i32, i32) {
    %c0_i32 = arith.constant 0 : i32
    %c0_i32_0 = arith.constant 0 : i32
    %c0_i32_1 = arith.constant 0 : i32
    return %c0_i32, %c0_i32_0 : i32, i32
  }
  func.func @transform_7(%arg0: i32) -> (i32, i32) {
    %c0_i32 = arith.constant 0 : i32
    %c0_i32_0 = arith.constant 0 : i32
    %c0_i32_1 = arith.constant 0 : i32
    return %c0_i32, %c0_i32_0 : i32, i32
  }
  func.func @transform_8(%arg0: i32) -> (i32, i32) {
    %c0_i32 = arith.constant 0 : i32
    %c0_i32_0 = arith.constant 0 : i32
    %c0_i32_1 = arith.constant 0 : i32
    return %c0_i32, %c0_i32_0 : i32, i32
  }
  func.func @transform_9(%arg0: i32) -> (i32, i32) {
    %c0_i32 = arith.constant 0 : i32
    %c0_i32_0 = arith.constant 0 : i32
    %c0_i32_1 = arith.constant 0 : i32
    return %c0_i32, %c0_i32_0 : i32, i32
  }
  func.func @transform_10(%arg0: i32) -> (i32, i32) {
    %c0_i32 = arith.constant 0 : i32
    %c0_i32_0 = arith.constant 0 : i32
    %c0_i32_1 = arith.constant 0 : i32
    return %c0_i32, %c0_i32_0 : i32, i32
  }
  func.func @transform_11(%arg0: i32) -> (i32, i32) {
    %c0_i32 = arith.constant 0 : i32
    %c0_i32_0 = arith.constant 0 : i32
    %c0_i32_1 = arith.constant 0 : i32
    return %c0_i32, %c0_i32_0 : i32, i32
  }
  func.func @transform_12(%arg0: i32) -> (i32, i32) {
    %c0_i32 = arith.constant 0 : i32
    %c0_i32_0 = arith.constant 0 : i32
    %c0_i32_1 = arith.constant 0 : i32
    return %c0_i32, %c0_i32_0 : i32, i32
  }
  func.func @transform_13(%arg0: i32) -> (i32, i32) {
    %c0_i32 = arith.constant 0 : i32
    %c0_i32_0 = arith.constant 0 : i32
    %c0_i32_1 = arith.constant 0 : i32
    return %c0_i32, %c0_i32_0 : i32, i32
  }
  func.func @transform_14(%arg0: i32) -> (i32, i32) {
    %c0_i32 = arith.constant 0 : i32
    %c0_i32_0 = arith.constant 0 : i32
    %c0_i32_1 = arith.constant 0 : i32
    return %c0_i32, %c0_i32_0 : i32, i32
  }
  func.func @transform_15(%arg0: i32) -> (i32, i32) {
    %c0_i32 = arith.constant 0 : i32
    %c0_i32_0 = arith.constant 0 : i32
    %c0_i32_1 = arith.constant 0 : i32
    return %c0_i32, %c0_i32_0 : i32, i32
  }
  func.func @transform_16(%arg0: i32) -> (i32, i32) {
    %c0_i32 = arith.constant 0 : i32
    %c0_i32_0 = arith.constant 0 : i32
    %c0_i32_1 = arith.constant 0 : i32
    return %c0_i32, %c0_i32_0 : i32, i32
  }
}

</mosaic_0001>

<bundles_post_ra>
// kernel: _e_gcl_forward.1
= control target key start
LH: loop header
LB: loop body
LE: loop exit
PB: predicated region body
PF: predicated region fallthrough
CT: control target
= control target key end

     0   :  { %s2085_s21 = smov 0   ;;  %s3030_s0 = inlined_call_operand.vmem [shape: s32[1,256], index: 0, kind: input, shape index: {}]   ;;  %s3031_s1 = inlined_call_operand.vmem [shape: f32[256,128], index: 1, kind: input, shape index: {}]   ;;  %s3032_s2 = inlined_call_operand.vmem [shape: f32[256,128], index: 2, kind: input, shape index: {}]   ;;  %s3033_s3 = inlined_call_operand.vmem [shape: f32[16,128], index: 3, kind: input, shape index: {}, may-alias: {3,15}]   ;;  %s3034_s4 = inlined_call_operand.vmem [shape: f32[8,16], index: 4, kind: input, shape index: {}]   ;;  %s3035_s5 = inlined_call_operand.vmem [shape: f32[128,128], index: 5, kind: input, shape index: {}]   ;;  %s3036_s6 = inlined_call_operand.vmem [shape: f32[128,128], index: 6, kind: input, shape index: {}]   ;;  %s3037_s7 = inlined_call_operand.vmem [shape: f32[1,128], index: 7, kind: input, shape index: {}]   ;;  %s3038_s8 = inlined_call_operand.vmem [shape: f32[128,128], index: 8, kind: input, shape index: {}]   ;;  %s3039_s9 = inlined_call_operand.vmem [shape: f32[1,128], index: 9, kind: input, shape index: {}]   ;;  %s3040_s10 = inlined_call_operand.vmem [shape: f32[128,128], index: 10, kind: input, shape index: {}]   ;;  %s3041_s11 = inlined_call_operand.vmem [shape: f32[128,128], index: 11, kind: input, shape index: {}]   ;;  %s3042_s12 = inlined_call_operand.vmem [shape: f32[1,128], index: 12, kind: input, shape index: {}]   ;;  %s3043_s13 = inlined_call_operand.vmem [shape: f32[128,128], index: 13, kind: input, shape index: {}]   ;;  %s3044_s14 = inlined_call_operand.vmem [shape: f32[1,128], index: 14, kind: input, shape index: {}]   ;;  %s3045_s15 = inlined_call_operand.vmem [shape: f32[16,128], index: 15, kind: output, shape index: {0}, may-alias: {3,15}]   ;;  %s3046_s16 = inlined_call_operand.vmem [shape: f32[8,128], index: 16, kind: output, shape index: {1}]  }
   0x1   :  { %3063 = sst [smem:[#allocation16_spill]] %s3030_s0 }
   0x2 LB: > { %s2091_s22 = sadd.s32 4294967295, %s1996_s21   ;;  %p1791_p0 = scmp.ge.s32.totalorder %s1996_s21, 1  ;;  %s1996_s21 = sphi %s2085_s21, %s27_s21  }
   0x3   : > { %p475_p1 = scmp.lt.s32.totalorder %s1996_s21, 3 }
   0x5   : > { %p476_p2 = pnand %p1791_p0, %p475_p1 }
   0x7   : > { %479 = sbr.rel (%p476_p2) target bundleno = 1147 (0x47b), region = 80 }
   0xc   : > { %p528_p3 = scmp.lt.s32.totalorder %s2091_s22, 1  ;;  %s1792_s23 = sshll.u32 %s2091_s22, 4 }
   0xd   : > { %p532_p4 = scmp.lt.s32.totalorder %s1792_s23, 31  ;;  %p1796_p5 = scmp.ne.s32.totalorder %s2091_s22, 0 }
   0xe   : > { %s2098_s24 = scalar_select %p528_p3, %s2091_s22, 1 }
   0xf   : > { %s3124_s23 = smov (!%p532_p4, %s1792_s23), 31  ;;  %546 = sbr.rel (%p1796_p5) target bundleno = 23 (0x17), region = 84 }
  0x10   : > { %s1793_s29 = sshll.u32 %s3124_s23, 3 }
  0x11   : > { %s2107_s17 = scalar_lea.vmem %s3031_s1, %s1793_s29  ;;  %s2112_s20 = scalar_lea.vmem %s3032_s2, %s1793_s29 }
  0x14   : > { %v1998_v0 = vmov 0.0  }
  0x15   : > { %547 = vst [vmem:[#allocation2] sm:$0xff] %v1998_v0 }
  0x16   : > { %548 = vst [vmem:[#allocation2 + $0x8] sm:$0xff] %v1998_v0 }
  0x17 PF: > { %v612_v1 = vld [vmem:[%s3036_s6 + $0x78] sm:$0xff]  ;;  %v611_v3 = vld [vmem:[%s3036_s6 + $0x70] sm:$0xff]  ;;  %v610_v5 = vld [vmem:[%s3036_s6 + $0x68] sm:$0xff]  ;;  %s3119_s25 = sld [smem:[#allocation16_spill]]  ;;  %p1833_p6 = scmp.ne.s32.totalorder %s2091_s22, 1 }
  0x18   : > { %v580_v2 = vld [vmem:[%s3035_s5 + $0x78] sm:$0xff]  ;;  %613 = vmatpush.msra.mxu0 %v612_v1  ;;  %v579_v4 = vld [vmem:[%s3035_s5 + $0x70] sm:$0xff]  ;;  %v578_v6 = vld [vmem:[%s3035_s5 + $0x68] sm:$0xff] }
  0x19   : > { %678 = vmatpush.msra.mxu1 %v580_v2  ;;  %v609_v7 = vld [vmem:[%s3036_s6 + $0x60] sm:$0xff]  ;;  %v608_v9 = vld [vmem:[%s3036_s6 + $0x58] sm:$0xff]  ;;  %v607_v11 = vld [vmem:[%s3036_s6 + $0x50] sm:$0xff] }
  0x1a   : > { %614 = vmatpush.msra.mxu0 %v611_v3  ;;  %v577_v8 = vld [vmem:[%s3035_s5 + $0x60] sm:$0xff]  ;;  %v576_v10 = vld [vmem:[%s3035_s5 + $0x58] sm:$0xff]  ;;  %v575_v12 = vld [vmem:[%s3035_s5 + $0x50] sm:$0xff] }
  0x1b   : > { %679 = vmatpush.msra.mxu1 %v579_v4  ;;  %v606_v13 = vld [vmem:[%s3036_s6 + $0x48] sm:$0xff]  ;;  %v605_v15 = vld [vmem:[%s3036_s6 + $0x40] sm:$0xff]  ;;  %v604_v17 = vld [vmem:[%s3036_s6 + $0x38] sm:$0xff] }
  0x1c   : > { %615 = vmatpush.msra.mxu0 %v610_v5  ;;  %v574_v14 = vld [vmem:[%s3035_s5 + $0x48] sm:$0xff]  ;;  %v573_v16 = vld [vmem:[%s3035_s5 + $0x40] sm:$0xff]  ;;  %v572_v18 = vld [vmem:[%s3035_s5 + $0x38] sm:$0xff] }
  0x1d   : > { %680 = vmatpush.msra.mxu1 %v578_v6  ;;  %v603_v19 = vld [vmem:[%s3036_s6 + $0x30] sm:$0xff]  ;;  %v602_v21 = vld [vmem:[%s3036_s6 + $0x28] sm:$0xff]  ;;  %v601_v23 = vld [vmem:[%s3036_s6 + $0x20] sm:$0xff]  ;;  %s3120_s26 = scalar_lea.vmem %s3119_s25, %s2098_s24 }
  0x1e   : > { %616 = vmatpush.msra.mxu0 %v609_v7  ;;  %v571_v20 = vld [vmem:[%s3035_s5 + $0x30] sm:$0xff]  ;;  %v570_v22 = vld [vmem:[%s3035_s5 + $0x28] sm:$0xff]  ;;  %v569_v24 = vld [vmem:[%s3035_s5 + $0x20] sm:$0xff] }
  0x1f   : > { %681 = vmatpush.msra.mxu1 %v577_v8  ;;  %v600_v25 = vld [vmem:[%s3036_s6 + $0x18] sm:$0xff]  ;;  %v599_v27 = vld [vmem:[%s3036_s6 + $0x10] sm:$0xff]  ;;  %v598_v29 = vld [vmem:[%s3036_s6 + $0x8] sm:$0xff] }
  0x20   : > { %617 = vmatpush.msra.mxu0 %v608_v9  ;;  %v568_v26 = vld [vmem:[%s3035_s5 + $0x18] sm:$0xff]  ;;  %v567_v28 = vld [vmem:[%s3035_s5 + $0x10] sm:$0xff]  ;;  %v566_v30 = vld [vmem:[%s3035_s5 + $0x8] sm:$0xff] }
  0x21   : > { %682 = vmatpush.msra.mxu1 %v576_v10  ;;  %v597_v31 = vld [vmem:[%s3036_s6] sm:$0xff]  ;;  %v582_v35 = vld [vmem:[%s2112_s20 + $0x8] sm:$0xff]  ;;  %v583_v37 = vld [vmem:[%s2112_s20 + $0x10] sm:$0xff] }
  0x22   : > { %618 = vmatpush.msra.mxu0 %v607_v11  ;;  %v565_v32 = vld [vmem:[%s3035_s5] sm:$0xff]  ;;  %v550_v36 = vld [vmem:[%s2107_s17 + $0x8] sm:$0xff]  ;;  %v551_v38 = vld [vmem:[%s2107_s17 + $0x10] sm:$0xff] }
  0x23   : > { %683 = vmatpush.msra.mxu1 %v575_v12  ;;  %v581_v33 = vld [vmem:[%s2112_s20] sm:$0xff]  ;;  %v584_v39 = vld [vmem:[%s2112_s20 + $0x18] sm:$0xff]  ;;  %v586_v43 = vld [vmem:[%s2112_s20 + $0x28] sm:$0xff] }
  0x24   : > { %619 = vmatpush.msra.mxu0 %v606_v13  ;;  %v549_v34 = vld [vmem:[%s2107_s17] sm:$0xff]  ;;  %v552_v40 = vld [vmem:[%s2107_s17 + $0x18] sm:$0xff]  ;;  %v554_v44 = vld [vmem:[%s2107_s17 + $0x28] sm:$0xff] }
  0x25   : > { %684 = vmatpush.msra.mxu1 %v574_v14  ;;  %v585_v41 = vld [vmem:[%s2112_s20 + $0x20] sm:$0xff]  ;;  %v587_v45 = vld [vmem:[%s2112_s20 + $0x30] sm:$0xff]  ;;  %v588_v47 = vld [vmem:[%s2112_s20 + $0x38] sm:$0xff] }
  0x26   : > { %620 = vmatpush.msra.mxu0 %v605_v15  ;;  %v553_v42 = vld [vmem:[%s2107_s17 + $0x20] sm:$0xff]  ;;  %v555_v46 = vld [vmem:[%s2107_s17 + $0x30] sm:$0xff]  ;;  %v556_v48 = vld [vmem:[%s2107_s17 + $0x38] sm:$0xff] }
  0x27   : > { %685 = vmatpush.msra.mxu1 %v573_v16  ;;  %v589_v49 = vld [vmem:[%s2112_s20 + $0x40] sm:$0xff]  ;;  %v590_v51 = vld [vmem:[%s2112_s20 + $0x48] sm:$0xff]  ;;  %v591_v53 = vld [vmem:[%s2112_s20 + $0x50] sm:$0xff] }
  0x28   : > { %621 = vmatpush.msra.mxu0 %v604_v17  ;;  %v557_v50 = vld [vmem:[%s2107_s17 + $0x40] sm:$0xff]  ;;  %v558_v52 = vld [vmem:[%s2107_s17 + $0x48] sm:$0xff]  ;;  %v559_v54 = vld [vmem:[%s2107_s17 + $0x50] sm:$0xff] }
  0x29   : > { %686 = vmatpush.msra.mxu1 %v572_v18  ;;  %v592_v55 = vld [vmem:[%s2112_s20 + $0x58] sm:$0xff]  ;;  %v593_v57 = vld [vmem:[%s2112_s20 + $0x60] sm:$0xff]  ;;  %v1097_v60 = vld [vmem:[%s3038_s8 + $0x70] sm:$0xff] }
  0x2a   : > { %622 = vmatpush.msra.mxu0 %v603_v19  ;;  %v560_v56 = vld [vmem:[%s2107_s17 + $0x58] sm:$0xff]  ;;  %v561_v58 = vld [vmem:[%s2107_s17 + $0x60] sm:$0xff]  ;;  %v1096_v61 = vld [vmem:[%s3038_s8 + $0x68] sm:$0xff] }
  0x2b   : > { %687 = vmatpush.msra.mxu1 %v571_v20  ;;  %v1098_v59 = vld [vmem:[%s3038_s8 + $0x78] sm:$0xff]  ;;  %v594_v62 = vld [vmem:[%s2112_s20 + $0x68] sm:$0xff]  ;;  %v1095_v0 = vld [vmem:[%s3038_s8 + $0x60] sm:$0xff] }
  0x2c   : > { %623 = vmatpush.msra.mxu0 %v602_v21  ;;  %1103 = vmatpush.msra.mxu2 %v1098_v59  ;;  %v562_v63 = vld [vmem:[%s2107_s17 + $0x68] sm:$0xff]  ;;  %v1094_v1 = vld [vmem:[%s3038_s8 + $0x58] sm:$0xff]  ;;  %v1093_v2 = vld [vmem:[%s3038_s8 + $0x50] sm:$0xff] }
  0x2d   : > { %688 = vmatpush.msra.mxu1 %v570_v22  ;;  %v1092_v3 = vld [vmem:[%s3038_s8 + $0x48] sm:$0xff]  ;;  %v595_v4 = vld [vmem:[%s2112_s20 + $0x70] sm:$0xff]  ;;  %v1091_v6 = vld [vmem:[%s3038_s8 + $0x40] sm:$0xff] }
  0x2e   : > { %624 = vmatpush.msra.mxu0 %v601_v23  ;;  %1104 = vmatpush.msra.mxu2 %v1097_v60  ;;  %v563_v5 = vld [vmem:[%s2107_s17 + $0x70] sm:$0xff]  ;;  %v1090_v7 = vld [vmem:[%s3038_s8 + $0x38] sm:$0xff]  ;;  %v1088_v9 = vld [vmem:[%s3038_s8 + $0x28] sm:$0xff] }
  0x2f   : > { %689 = vmatpush.msra.mxu1 %v569_v24  ;;  %v1089_v8 = vld [vmem:[%s3038_s8 + $0x30] sm:$0xff]  ;;  %v596_v10 = vld [vmem:[%s2112_s20 + $0x78] sm:$0xff]  ;;  %v1087_v12 = vld [vmem:[%s3038_s8 + $0x20] sm:$0xff] }
  0x30   : > { %625 = vmatpush.msra.mxu0 %v600_v25  ;;  %1105 = vmatpush.msra.mxu2 %v1096_v61  ;;  %v564_v11 = vld [vmem:[%s2107_s17 + $0x78] sm:$0xff]  ;;  %v1085_v14 = vld [vmem:[%s3038_s8 + $0x10] sm:$0xff]  ;;  %v2288_v15 = vld [vmem:[%s3037_s7] ss:$0 sm:$0xff] }
  0x31   : > { %690 = vmatpush.msra.mxu1 %v568_v26  ;;  %v1086_v13 = vld [vmem:[%s3038_s8 + $0x18] sm:$0xff]  ;;  %v1084_v16 = vld [vmem:[%s3038_s8 + $0x8] sm:$0xff]  ;;  %v1083_v20 = vld [vmem:[%s3038_s8] sm:$0xff] }
  0x32   : > { %626 = vmatpush.msra.mxu0 %v599_v27  ;;  %1106 = vmatpush.msra.mxu2 %v1095_v0 }
  0x33   : > { %691 = vmatpush.msra.mxu1 %v567_v28 }
  0x34   : > { %627 = vmatpush.msra.mxu0 %v598_v29  ;;  %1107 = vmatpush.msra.mxu2 %v1094_v1 }
  0x35   : > { %692 = vmatpush.msra.mxu1 %v566_v30 }
  0x36   : > { %628 = vmatpush.msra.mxu0 %v597_v31  ;;  %1108 = vmatpush.msra.mxu2 %v1093_v2 }
  0x37   : > { %693 = vmatpush.msra.mxu1 %v565_v32  ;;  %629 = vmatmul.f32.vlgmr.msra.gmra.mxu0 %v581_v33 }
  0x38   : > { %694 = vmatmul.f32.vlgmr.msra.gmra.mxu1 %v549_v34  ;;  %1109 = vmatpush.msra.mxu2 %v1092_v3 }
  0x3a   : > { %1110 = vmatpush.msra.mxu2 %v1091_v6 }
  0x3c   : > { %1111 = vmatpush.msra.mxu2 %v1090_v7 }
  0x3e   : > { %1112 = vmatpush.msra.mxu2 %v1089_v8 }
  0x3f   : > { %632 = vmatmul.f32.gmra.mxu0 %v582_v35 }
  0x40   : > { %697 = vmatmul.f32.gmra.mxu1 %v550_v36  ;;  %1113 = vmatpush.msra.mxu2 %v1088_v9 }
  0x42   : > { %1114 = vmatpush.msra.mxu2 %v1087_v12 }
  0x44   : > { %1115 = vmatpush.msra.mxu2 %v1086_v13 }
  0x46   : > { %1116 = vmatpush.msra.mxu2 %v1085_v14 }
  0x47   : > { %635 = vmatmul.f32.gmra.mxu0 %v583_v37 }
  0x48   : > { %700 = vmatmul.f32.gmra.mxu1 %v551_v38  ;;  %1117 = vmatpush.msra.mxu2 %v1084_v16 }
  0x4a   : > { %1118 = vmatpush.msra.mxu2 %v1083_v20 }
  0x4f   : > { %638 = vmatmul.f32.gmra.mxu0 %v584_v39 }
  0x50   : > { %703 = vmatmul.f32.gmra.mxu1 %v552_v40 }
  0x57   : > { %641 = vmatmul.f32.gmra.mxu0 %v585_v41 }
  0x58   : > { %706 = vmatmul.f32.gmra.mxu1 %v553_v42 }
  0x5f   : > { %644 = vmatmul.f32.gmra.mxu0 %v586_v43 }
  0x60   : > { %709 = vmatmul.f32.gmra.mxu1 %v554_v44 }
  0x67   : > { %647 = vmatmul.f32.gmra.mxu0 %v587_v45 }
  0x68   : > { %712 = vmatmul.f32.gmra.mxu1 %v555_v46 }
  0x6f   : > { %650 = vmatmul.f32.gmra.mxu0 %v588_v47 }
  0x70   : > { %715 = vmatmul.f32.gmra.mxu1 %v556_v48 }
  0x77   : > { %653 = vmatmul.f32.gmra.mxu0 %v589_v49 }
  0x78   : > { %718 = vmatmul.f32.gmra.mxu1 %v557_v50 }
  0x7f   : > { %656 = vmatmul.f32.gmra.mxu0 %v590_v51 }
  0x80   : > { %721 = vmatmul.f32.gmra.mxu1 %v558_v52 }
  0x87   : > { %659 = vmatmul.f32.gmra.mxu0 %v591_v53 }
  0x88   : > { %724 = vmatmul.f32.gmra.mxu1 %v559_v54 }
  0x8f   : > { %662 = vmatmul.f32.gmra.mxu0 %v592_v55 }
  0x90   : > { %727 = vmatmul.f32.gmra.mxu1 %v560_v56 }
  0x97   : > { %665 = vmatmul.f32.gmra.mxu0 %v593_v57 }
  0x98   : > { %730 = vmatmul.f32.gmra.mxu1 %v561_v58 }
  0x9f   : > { %668 = vmatmul.f32.gmra.mxu0 %v594_v62 }
  0xa0   : > { %733 = vmatmul.f32.gmra.mxu1 %v562_v63 }
  0xa7   : > { %671 = vmatmul.f32.gmra.mxu0 %v595_v4 }
  0xa8   : > { %736 = vmatmul.f32.gmra.mxu1 %v563_v5 }
  0xaf   : > { %674 = vmatmul.f32.gmra.mxu0 %v596_v10 }
  0xb0   : > { %739 = vmatmul.f32.gmra.mxu1 %v564_v11 }
  0xb4   : > { %v630_v17 = vpop.f32.mrf.mxu0 }
  0xb5   : > { %v695_v18 = vpop.f32.mrf.mxu1 }
  0xb6   : > { %v696_v19 = vadd.f32 %v695_v18, %v630_v17 }
  0xb8   : > { %v747_v21 = vadd.f32 %v2288_v15, %v696_v19 }
  0xba   : > { %v1797_v22 = vmul.f32 -1.442695, %v747_v21 }
  0xbc   : > { %1852 = vpow2.f32 %v1797_v22  ;;  %v633_v23 = vpop.f32.mrf.mxu0 }
  0xbd   : > { %v698_v24 = vpop.f32.mrf.mxu1 }
  0xbe   : > { %v699_v25 = vadd.f32 %v698_v24, %v633_v23 }
  0xc0   : > { %v2298_v26 = vadd.f32 %v2288_v15, %v699_v25 }
  0xc2   : > { %v1853_v27 = vpop.eup %1852  ;;  %v1798_v28 = vmul.f32 -1.442695, %v2298_v26 }
  0xc3   : > { %v811_v29 = vadd.f32 1.0, %v1853_v27 }
  0xc4   : > { %1854 = vpow2.f32 %v1798_v28  ;;  %v636_v30 = vpop.f32.mrf.mxu0 }
  0xc5   : > { %1856 = vrcp.f32 %v811_v29  ;;  %v701_v31 = vpop.f32.mrf.mxu1  ;;  %v838_v43 = vand.u32 2147483648, %v811_v29  ;;  %v836_v46 = vand.u32 2147483647, %v811_v29  ;;  %vm832_vm1 = vweird.f32 %v811_v29 }
  0xc6   : > { %v702_v32 = vadd.f32 %v701_v31, %v636_v30 }
  0xc7   : > { %v839_v52 = vor.u32 1.1754944e-38, %v838_v43  ;;  %vm837_vm3 = vcmp.eq.f32.partialorder %v836_v46, 8.507059e+37 }
  0xc8   : > { %v2302_v33 = vadd.f32 %v2288_v15, %v702_v32 }
  0xca   : > { %v1855_v34 = vpop.eup %1854  ;;  %v1799_v35 = vmul.f32 -1.442695, %v2302_v33 }
  0xcb   : > { %v1857_v36 = vpop.eup %1856  ;;  %v812_v37 = vadd.f32 1.0, %v1855_v34 }
  0xcc   : > { %1858 = vpow2.f32 %v1799_v35  ;;  %v828_v38 = vmul.f32 %v1857_v36, %v811_v29  ;;  %v639_v39 = vpop.f32.mrf.mxu0  ;;  %vm833_vm0 = vweird.f32 %v1857_v36 }
  0xcd   : > { %1860 = vrcp.f32 %v812_v37  ;;  %v704_v40 = vpop.f32.mrf.mxu1  ;;  %vm834_vm2 = vmor %vm832_vm1, %vm833_vm0  ;;  %v853_v61 = vand.u32 2147483648, %v812_v37  ;;  %v851_v0 = vand.u32 2147483647, %v812_v37  ;;  %vm847_vm5 = vweird.f32 %v812_v37 }
  0xce   : > { %v705_v41 = vadd.f32 %v704_v40, %v639_v39  ;;  %v829_v42 = vsub.f32 1.0, %v828_v38 }
  0xcf   : > { %v854_v6 = vor.u32 1.1754944e-38, %v853_v61  ;;  %vm852_vm7 = vcmp.eq.f32.partialorder %v851_v0, 8.507059e+37 }
  0xd0   : > { %v2306_v44 = vadd.f32 %v2288_v15, %v705_v41  ;;  %v830_v45 = vmul.f32 %v1857_v36, %v829_v42 }
  0xd2   : > { %v1859_v47 = vpop.eup %1858  ;;  %v1800_v48 = vmul.f32 -1.442695, %v2306_v44  ;;  %v831_v49 = vadd.f32 %v1857_v36, %v830_v45 }
  0xd3   : > { %v1861_v50 = vpop.eup %1860  ;;  %v813_v51 = vadd.f32 1.0, %v1859_v47 }
  0xd4   : > { %1862 = vpow2.f32 %v1800_v48  ;;  %v835_v53 = vsel %vm834_vm2, %v1857_v36, %v831_v49  ;;  %v843_v54 = vmul.f32 %v1861_v50, %v812_v37  ;;  %v642_v55 = vpop.f32.mrf.mxu0  ;;  %vm848_vm4 = vweird.f32 %v1861_v50 }
  0xd5   : > { %1864 = vrcp.f32 %v813_v51  ;;  %v707_v56 = vpop.f32.mrf.mxu1  ;;  %v840_v57 = vsel %vm837_vm3, %v839_v52, %v835_v53  ;;  %vm849_vm6 = vmor %vm847_vm5, %vm848_vm4  ;;  %v868_v16 = vand.u32 2147483648, %v813_v51  ;;  %v866_v19 = vand.u32 2147483647, %v813_v51 }
  0xd6   : > { %v708_v58 = vadd.f32 %v707_v56, %v642_v55  ;;  %v1067_v59 = vmul.f32 %v840_v57, %v747_v21  ;;  %v844_v60 = vsub.f32 1.0, %v843_v54  ;;  %vm862_vm9 = vweird.f32 %v813_v51 }
  0xd7   : > { %v869_v25 = vor.u32 1.1754944e-38, %v868_v16  ;;  %vm867_vm11 = vcmp.eq.f32.partialorder %v866_v19, 8.507059e+37 }
  0xd8   : > { %v2310_v62 = vadd.f32 %v2288_v15, %v708_v58  ;;  %1119 = vmatmul.f32.vlgmr.msra.gmra.mxu2 %v1067_v59  ;;  %v845_v63 = vmul.f32 %v1861_v50, %v844_v60 }
  0xda   : > { %v1863_v1 = vpop.eup %1862  ;;  %v1801_v2 = vmul.f32 -1.442695, %v2310_v62  ;;  %v846_v3 = vadd.f32 %v1861_v50, %v845_v63 }
  0xdb   : > { %v1865_v4 = vpop.eup %1864  ;;  %v814_v5 = vadd.f32 1.0, %v1863_v1 }
  0xdc   : > { %1866 = vpow2.f32 %v1801_v2  ;;  %v850_v7 = vsel %vm849_vm6, %v1861_v50, %v846_v3  ;;  %v858_v8 = vmul.f32 %v1865_v4, %v813_v51  ;;  %v645_v9 = vpop.f32.mrf.mxu0  ;;  %vm863_vm8 = vweird.f32 %v1865_v4 }
  0xdd   : > { %1868 = vrcp.f32 %v814_v5  ;;  %v710_v10 = vpop.f32.mrf.mxu1  ;;  %v855_v11 = vsel %vm852_vm7, %v854_v6, %v850_v7  ;;  %vm864_vm10 = vmor %vm862_vm9, %vm863_vm8  ;;  %v883_v35 = vand.u32 2147483648, %v814_v5  ;;  %v881_v38 = vand.u32 2147483647, %v814_v5 }
  0xde   : > { %v711_v12 = vadd.f32 %v710_v10, %v645_v9  ;;  %v1068_v13 = vmul.f32 %v855_v11, %v2298_v26  ;;  %v859_v14 = vsub.f32 1.0, %v858_v8  ;;  %vm877_vm13 = vweird.f32 %v814_v5 }
  0xdf   : > { %v884_v45 = vor.u32 1.1754944e-38, %v883_v35  ;;  %vm882_vm15 = vcmp.eq.f32.partialorder %v881_v38, 8.507059e+37 }
  0xe0   : > { %v2315_v17 = vadd.f32 %v2288_v15, %v711_v12  ;;  %1122 = vmatmul.f32.gmra.mxu2 %v1068_v13  ;;  %v860_v18 = vmul.f32 %v1865_v4, %v859_v14 }
  0xe2   : > { %v1867_v20 = vpop.eup %1866  ;;  %v1802_v21 = vmul.f32 -1.442695, %v2315_v17  ;;  %v861_v22 = vadd.f32 %v1865_v4, %v860_v18 }
  0xe3   : > { %v1869_v23 = vpop.eup %1868  ;;  %v815_v24 = vadd.f32 1.0, %v1867_v20 }
  0xe4   : > { %1870 = vpow2.f32 %v1802_v21  ;;  %v865_v26 = vsel %vm864_vm10, %v1865_v4, %v861_v22  ;;  %v873_v27 = vmul.f32 %v1869_v23, %v814_v5  ;;  %v648_v28 = vpop.f32.mrf.mxu0  ;;  %vm878_vm12 = vweird.f32 %v1869_v23 }
  0xe5   : > { %1872 = vrcp.f32 %v815_v24  ;;  %v713_v29 = vpop.f32.mrf.mxu1  ;;  %v870_v30 = vsel %vm867_vm11, %v869_v25, %v865_v26  ;;  %vm879_vm14 = vmor %vm877_vm13, %vm878_vm12  ;;  %v898_v53 = vand.u32 2147483648, %v815_v24  ;;  %v896_v56 = vand.u32 2147483647, %v815_v24 }
  0xe6   : > { %v714_v31 = vadd.f32 %v713_v29, %v648_v28  ;;  %v1069_v32 = vmul.f32 %v870_v30, %v2302_v33  ;;  %v874_v34 = vsub.f32 1.0, %v873_v27  ;;  %vm892_vm1 = vweird.f32 %v815_v24 }
  0xe7   : > { %v899_v63 = vor.u32 1.1754944e-38, %v898_v53  ;;  %vm897_vm3 = vcmp.eq.f32.partialorder %v896_v56, 8.507059e+37 }
  0xe8   : > { %v2320_v36 = vadd.f32 %v2288_v15, %v714_v31  ;;  %1125 = vmatmul.f32.gmra.mxu2 %v1069_v32  ;;  %v875_v37 = vmul.f32 %v1869_v23, %v874_v34 }
  0xea   : > { %v1871_v39 = vpop.eup %1870  ;;  %v1803_v40 = vmul.f32 -1.442695, %v2320_v36  ;;  %v876_v41 = vadd.f32 %v1869_v23, %v875_v37 }
  0xeb   : > { %v1873_v42 = vpop.eup %1872  ;;  %v816_v43 = vadd.f32 1.0, %v1871_v39 }
  0xec   : > { %1874 = vpow2.f32 %v1803_v40  ;;  %v880_v33 = vsel %vm879_vm14, %v1869_v23, %v876_v41  ;;  %v888_v46 = vmul.f32 %v1873_v42, %v815_v24  ;;  %v651_v47 = vpop.f32.mrf.mxu0  ;;  %vm893_vm0 = vweird.f32 %v1873_v42 }
  0xed   : > { %1876 = vrcp.f32 %v816_v43  ;;  %v716_v48 = vpop.f32.mrf.mxu1  ;;  %v885_v49 = vsel %vm882_vm15, %v884_v45, %v880_v33  ;;  %vm894_vm2 = vmor %vm892_vm1, %vm893_vm0  ;;  %v913_v7 = vand.u32 2147483648, %v816_v43  ;;  %v911_v10 = vand.u32 2147483647, %v816_v43 }
  0xee   : > { %v717_v50 = vadd.f32 %v716_v48, %v651_v47  ;;  %v1070_v51 = vmul.f32 %v885_v49, %v2306_v44  ;;  %v889_v52 = vsub.f32 1.0, %v888_v46  ;;  %vm907_vm5 = vweird.f32 %v816_v43 }
  0xef   : > { %v914_v18 = vor.u32 1.1754944e-38, %v913_v7  ;;  %vm912_vm7 = vcmp.eq.f32.partialorder %v911_v10, 8.507059e+37 }
  0xf0   : > { %v2325_v54 = vadd.f32 %v2288_v15, %v717_v50  ;;  %1128 = vmatmul.f32.gmra.mxu2 %v1070_v51  ;;  %v890_v55 = vmul.f32 %v1873_v42, %v889_v52 }
  0xf2   : > { %v1875_v57 = vpop.eup %1874  ;;  %v1804_v58 = vmul.f32 -1.442695, %v2325_v54  ;;  %v891_v59 = vadd.f32 %v1873_v42, %v890_v55 }
  0xf3   : > { %v1877_v60 = vpop.eup %1876  ;;  %v817_v61 = vadd.f32 1.0, %v1875_v57 }
  0xf4   : > { %1878 = vpow2.f32 %v1804_v58  ;;  %v895_v44 = vsel %vm894_vm2, %v1873_v42, %v891_v59  ;;  %v903_v0 = vmul.f32 %v1877_v60, %v816_v43  ;;  %v654_v1 = vpop.f32.mrf.mxu0  ;;  %vm908_vm4 = vweird.f32 %v1877_v60 }
  0xf5   : > { %1880 = vrcp.f32 %v817_v61  ;;  %v719_v2 = vpop.f32.mrf.mxu1  ;;  %v900_v3 = vsel %vm897_vm3, %v899_v63, %v895_v44  ;;  %vm909_vm6 = vmor %vm907_vm5, %vm908_vm4  ;;  %v928_v26 = vand.u32 2147483648, %v817_v61  ;;  %v926_v29 = vand.u32 2147483647, %v817_v61 }
  0xf6   : > { %v720_v4 = vadd.f32 %v719_v2, %v654_v1  ;;  %v1071_v5 = vmul.f32 %v900_v3, %v2310_v62  ;;  %v904_v6 = vsub.f32 1.0, %v903_v0  ;;  %vm922_vm9 = vweird.f32 %v817_v61 }
  0xf7   : > { %v929_v37 = vor.u32 1.1754944e-38, %v928_v26  ;;  %vm927_vm11 = vcmp.eq.f32.partialorder %v926_v29, 8.507059e+37 }
  0xf8   : > { %v2330_v8 = vadd.f32 %v2288_v15, %v720_v4  ;;  %1131 = vmatmul.f32.gmra.mxu2 %v1071_v5  ;;  %v905_v9 = vmul.f32 %v1877_v60, %v904_v6 }
  0xfa   : > { %v1879_v11 = vpop.eup %1878  ;;  %v1805_v12 = vmul.f32 -1.442695, %v2330_v8  ;;  %v906_v13 = vadd.f32 %v1877_v60, %v905_v9 }
  0xfb   : > { %v1881_v14 = vpop.eup %1880  ;;  %v818_v16 = vadd.f32 1.0, %v1879_v11 }
  0xfc   : > { %1882 = vpow2.f32 %v1805_v12  ;;  %v910_v62 = vsel %vm909_vm6, %v1877_v60, %v906_v13  ;;  %v918_v19 = vmul.f32 %v1881_v14, %v817_v61  ;;  %v657_v20 = vpop.f32.mrf.mxu0  ;;  %vm923_vm8 = vweird.f32 %v1881_v14 }
  0xfd   : > { %1884 = vrcp.f32 %v818_v16  ;;  %v722_v21 = vpop.f32.mrf.mxu1  ;;  %v915_v22 = vsel %vm912_vm7, %v914_v18, %v910_v62  ;;  %vm924_vm10 = vmor %vm922_vm9, %vm923_vm8  ;;  %v943_v33 = vand.u32 2147483648, %v818_v16  ;;  %v941_v48 = vand.u32 2147483647, %v818_v16 }
  0xfe   : > { %v723_v23 = vadd.f32 %v722_v21, %v657_v20  ;;  %v1072_v24 = vmul.f32 %v915_v22, %v2315_v17  ;;  %v919_v25 = vsub.f32 1.0, %v918_v19  ;;  %vm937_vm13 = vweird.f32 %v818_v16 }
  0xff   : > { %v944_v55 = vor.u32 1.1754944e-38, %v943_v33  ;;  %vm942_vm15 = vcmp.eq.f32.partialorder %v941_v48, 8.507059e+37 }
 0x100   : > { %v2335_v27 = vadd.f32 %v2288_v15, %v723_v23  ;;  %1134 = vmatmul.f32.gmra.mxu2 %v1072_v24  ;;  %v920_v28 = vmul.f32 %v1881_v14, %v919_v25 }
 0x102   : > { %v1883_v30 = vpop.eup %1882  ;;  %v1806_v31 = vmul.f32 -1.442695, %v2335_v27  ;;  %v921_v32 = vadd.f32 %v1881_v14, %v920_v28 }
 0x103   : > { %v1885_v34 = vpop.eup %1884  ;;  %v819_v35 = vadd.f32 1.0, %v1883_v30 }
 0x104   : > { %1886 = vpow2.f32 %v1806_v31  ;;  %v925_v17 = vsel %vm924_vm10, %v1881_v14, %v921_v32  ;;  %v933_v38 = vmul.f32 %v1885_v34, %v818_v16  ;;  %v660_v39 = vpop.f32.mrf.mxu0  ;;  %vm938_vm12 = vweird.f32 %v1885_v34 }
 0x105   : > { %1888 = vrcp.f32 %v819_v35  ;;  %v725_v40 = vpop.f32.mrf.mxu1  ;;  %v930_v41 = vsel %vm927_vm11, %v929_v37, %v925_v17  ;;  %vm939_vm14 = vmor %vm937_vm13, %vm938_vm12  ;;  %v958_v44 = vand.u32 2147483648, %v819_v35  ;;  %v956_v2 = vand.u32 2147483647, %v819_v35 }
 0x106   : > { %v726_v42 = vadd.f32 %v725_v40, %v660_v39  ;;  %v1073_v43 = vmul.f32 %v930_v41, %v2320_v36  ;;  %v934_v45 = vsub.f32 1.0, %v933_v38  ;;  %vm952_vm1 = vweird.f32 %v819_v35 }
 0x107   : > { %v959_v9 = vor.u32 1.1754944e-38, %v958_v44  ;;  %vm957_vm3 = vcmp.eq.f32.partialorder %v956_v2, 8.507059e+37 }
 0x108   : > { %v2340_v46 = vadd.f32 %v2288_v15, %v726_v42  ;;  %1137 = vmatmul.f32.gmra.mxu2 %v1073_v43  ;;  %v935_v47 = vmul.f32 %v1885_v34, %v934_v45 }
 0x10a   : > { %v1887_v49 = vpop.eup %1886  ;;  %v1807_v50 = vmul.f32 -1.442695, %v2340_v46  ;;  %v936_v51 = vadd.f32 %v1885_v34, %v935_v47 }
 0x10b   : > { %v1889_v52 = vpop.eup %1888  ;;  %v820_v53 = vadd.f32 1.0, %v1887_v49 }
 0x10c   : > { %1890 = vpow2.f32 %v1807_v50  ;;  %v940_v36 = vsel %vm939_vm14, %v1885_v34, %v936_v51  ;;  %v948_v56 = vmul.f32 %v1889_v52, %v819_v35  ;;  %v663_v57 = vpop.f32.mrf.mxu0  ;;  %vm953_vm0 = vweird.f32 %v1889_v52 }
 0x10d   : > { %1892 = vrcp.f32 %v820_v53  ;;  %v728_v58 = vpop.f32.mrf.mxu1  ;;  %v945_v59 = vsel %vm942_vm15, %v944_v55, %v940_v36  ;;  %vm954_vm2 = vmor %vm952_vm1, %vm953_vm0  ;;  %v973_v62 = vand.u32 2147483648, %v820_v53  ;;  %v971_v21 = vand.u32 2147483647, %v820_v53 }
 0x10e   : > { %v729_v60 = vadd.f32 %v728_v58, %v663_v57  ;;  %v1074_v61 = vmul.f32 %v945_v59, %v2325_v54  ;;  %v949_v63 = vsub.f32 1.0, %v948_v56  ;;  %vm967_vm5 = vweird.f32 %v820_v53 }
 0x10f   : > { %v974_v28 = vor.u32 1.1754944e-38, %v973_v62  ;;  %vm972_vm7 = vcmp.eq.f32.partialorder %v971_v21, 8.507059e+37 }
 0x110   : > { %v2345_v0 = vadd.f32 %v2288_v15, %v729_v60  ;;  %1140 = vmatmul.f32.gmra.mxu2 %v1074_v61  ;;  %v950_v1 = vmul.f32 %v1889_v52, %v949_v63 }
 0x112   : > { %v1891_v3 = vpop.eup %1890  ;;  %v1808_v4 = vmul.f32 -1.442695, %v2345_v0  ;;  %v951_v5 = vadd.f32 %v1889_v52, %v950_v1 }
 0x113   : > { %v1893_v6 = vpop.eup %1892  ;;  %v821_v7 = vadd.f32 1.0, %v1891_v3 }
 0x114   : > { %1894 = vpow2.f32 %v1808_v4  ;;  %v955_v54 = vsel %vm954_vm2, %v1889_v52, %v951_v5  ;;  %v963_v10 = vmul.f32 %v1893_v6, %v820_v53  ;;  %v666_v11 = vpop.f32.mrf.mxu0  ;;  %vm968_vm4 = vweird.f32 %v1893_v6 }
 0x115   : > { %1896 = vrcp.f32 %v821_v7  ;;  %v731_v12 = vpop.f32.mrf.mxu1  ;;  %v960_v13 = vsel %vm957_vm3, %v959_v9, %v955_v54  ;;  %vm969_vm6 = vmor %vm967_vm5, %vm968_vm4  ;;  %v988_v17 = vand.u32 2147483648, %v821_v7  ;;  %v986_v40 = vand.u32 2147483647, %v821_v7 }
 0x116   : > { %v732_v14 = vadd.f32 %v731_v12, %v666_v11  ;;  %v1075_v16 = vmul.f32 %v960_v13, %v2330_v8  ;;  %v964_v18 = vsub.f32 1.0, %v963_v10  ;;  %vm982_vm9 = vweird.f32 %v821_v7 }
 0x117   : > { %v989_v47 = vor.u32 1.1754944e-38, %v988_v17  ;;  %vm987_vm11 = vcmp.eq.f32.partialorder %v986_v40, 8.507059e+37 }
 0x118   : > { %v2350_v19 = vadd.f32 %v2288_v15, %v732_v14  ;;  %1143 = vmatmul.f32.gmra.mxu2 %v1075_v16  ;;  %v965_v20 = vmul.f32 %v1893_v6, %v964_v18 }
 0x11a   : > { %v1895_v22 = vpop.eup %1894  ;;  %v1809_v23 = vmul.f32 -1.442695, %v2350_v19  ;;  %v966_v24 = vadd.f32 %v1893_v6, %v965_v20 }
 0x11b   : > { %v1897_v25 = vpop.eup %1896  ;;  %v822_v26 = vadd.f32 1.0, %v1895_v22 }
 0x11c   : > { %1898 = vpow2.f32 %v1809_v23  ;;  %v970_v8 = vsel %vm969_vm6, %v1893_v6, %v966_v24  ;;  %v978_v29 = vmul.f32 %v1897_v25, %v821_v7  ;;  %v669_v30 = vpop.f32.mrf.mxu0  ;;  %vm983_vm8 = vweird.f32 %v1897_v25 }
 0x11d   : > { %1900 = vrcp.f32 %v822_v26  ;;  %v734_v31 = vpop.f32.mrf.mxu1  ;;  %v975_v32 = vsel %vm972_vm7, %v974_v28, %v970_v8  ;;  %vm984_vm10 = vmor %vm982_vm9, %vm983_vm8  ;;  %v1003_v36 = vand.u32 2147483648, %v822_v26  ;;  %v1001_v58 = vand.u32 2147483647, %v822_v26 }
 0x11e   : > { %v735_v34 = vadd.f32 %v734_v31, %v669_v30  ;;  %v1076_v35 = vmul.f32 %v975_v32, %v2335_v27  ;;  %v979_v37 = vsub.f32 1.0, %v978_v29  ;;  %vm997_vm13 = vweird.f32 %v822_v26 }
 0x11f   : > { %v1004_v1 = vor.u32 1.1754944e-38, %v1003_v36  ;;  %vm1002_vm15 = vcmp.eq.f32.partialorder %v1001_v58, 8.507059e+37 }
 0x120   : > { %v2355_v38 = vadd.f32 %v2288_v15, %v735_v34  ;;  %1146 = vmatmul.f32.gmra.mxu2 %v1076_v35  ;;  %v980_v39 = vmul.f32 %v1897_v25, %v979_v37 }
 0x122   : > { %v1899_v41 = vpop.eup %1898  ;;  %v1810_v42 = vmul.f32 -1.442695, %v2355_v38  ;;  %v981_v43 = vadd.f32 %v1897_v25, %v980_v39 }
 0x123   : > { %v1901_v45 = vpop.eup %1900  ;;  %v823_v33 = vadd.f32 1.0, %v1899_v41 }
 0x124   : > { %1902 = vpow2.f32 %v1810_v42  ;;  %v985_v27 = vsel %vm984_vm10, %v1897_v25, %v981_v43  ;;  %v993_v48 = vmul.f32 %v1901_v45, %v822_v26  ;;  %v672_v49 = vpop.f32.mrf.mxu0  ;;  %vm998_vm12 = vweird.f32 %v1901_v45 }
 0x125   : > { %1904 = vrcp.f32 %v823_v33  ;;  %v737_v50 = vpop.f32.mrf.mxu1  ;;  %v990_v51 = vsel %vm987_vm11, %v989_v47, %v985_v27  ;;  %vm999_vm14 = vmor %vm997_vm13, %vm998_vm12  ;;  %v1018_v54 = vand.u32 2147483648, %v823_v33  ;;  %v1016_v12 = vand.u32 2147483647, %v823_v33 }
 0x126   : > { %v738_v52 = vadd.f32 %v737_v50, %v672_v49  ;;  %v1077_v53 = vmul.f32 %v990_v51, %v2340_v46  ;;  %v994_v55 = vsub.f32 1.0, %v993_v48  ;;  %vm1012_vm1 = vweird.f32 %v823_v33 }
 0x127   : > { %v1019_v20 = vor.u32 1.1754944e-38, %v1018_v54  ;;  %vm1017_vm3 = vcmp.eq.f32.partialorder %v1016_v12, 8.507059e+37 }
 0x128   : > { %v2360_v56 = vadd.f32 %v2288_v15, %v738_v52  ;;  %1149 = vmatmul.f32.gmra.mxu2 %v1077_v53  ;;  %v995_v57 = vmul.f32 %v1901_v45, %v994_v55 }
 0x12a   : > { %v1903_v59 = vpop.eup %1902  ;;  %v1811_v60 = vmul.f32 -1.442695, %v2360_v56  ;;  %v996_v61 = vadd.f32 %v1901_v45, %v995_v57 }
 0x12b   : > { %v1905_v63 = vpop.eup %1904  ;;  %v824_v44 = vadd.f32 1.0, %v1903_v59 }
 0x12c   : > { %1906 = vpow2.f32 %v1811_v60  ;;  %v1000_v46 = vsel %vm999_vm14, %v1901_v45, %v996_v61  ;;  %v1008_v2 = vmul.f32 %v1905_v63, %v823_v33  ;;  %v675_v3 = vpop.f32.mrf.mxu0  ;;  %vm1013_vm0 = vweird.f32 %v1905_v63 }
 0x12d   : > { %1908 = vrcp.f32 %v824_v44  ;;  %v740_v4 = vpop.f32.mrf.mxu1  ;;  %v1005_v5 = vsel %vm1002_vm15, %v1004_v1, %v1000_v46  ;;  %vm1014_vm2 = vmor %vm1012_vm1, %vm1013_vm0  ;;  %v1033_v24 = vand.u32 2147483648, %v824_v44  ;;  %v1031_v26 = vand.u32 2147483647, %v824_v44 }
 0x12e   : > { %v741_v6 = vadd.f32 %v740_v4, %v675_v3  ;;  %v1078_v7 = vmul.f32 %v1005_v5, %v2345_v0  ;;  %v1009_v9 = vsub.f32 1.0, %v1008_v2  ;;  %vm1027_vm5 = vweird.f32 %v824_v44  ;;  %v2375_v2 = vld [vmem:[%s3039_s9] ss:$0 sm:$0xff] }
 0x12f   : > { %v1034_v31 = vor.u32 1.1754944e-38, %v1033_v24  ;;  %vm1032_vm7 = vcmp.eq.f32.partialorder %v1031_v26, 8.507059e+37 }
 0x130   : > { %v2365_v10 = vadd.f32 %v2288_v15, %v741_v6  ;;  %1152 = vmatmul.f32.gmra.mxu2 %v1078_v7  ;;  %v1010_v11 = vmul.f32 %v1905_v63, %v1009_v9 }
 0x132   : > { %v1907_v13 = vpop.eup %1906  ;;  %v1812_v14 = vmul.f32 -1.442695, %v2365_v10  ;;  %v1011_v16 = vadd.f32 %v1905_v63, %v1010_v11 }
 0x133   : > { %v1909_v18 = vpop.eup %1908  ;;  %v825_v62 = vadd.f32 1.0, %v1907_v13 }
 0x134   : > { %1910 = vpow2.f32 %v1812_v14  ;;  %v1015_v0 = vsel %vm1014_vm2, %v1905_v63, %v1011_v16  ;;  %v1023_v21 = vmul.f32 %v1909_v18, %v824_v44  ;;  %vm1028_vm4 = vweird.f32 %v1909_v18 }
 0x135   : > { %1912 = vrcp.f32 %v825_v62  ;;  %v1020_v15 = vsel %vm1017_vm3, %v1019_v20, %v1015_v0  ;;  %vm1029_vm6 = vmor %vm1027_vm5, %vm1028_vm4  ;;  %v1048_v17 = vand.u32 2147483648, %v825_v62  ;;  %v1046_v40 = vand.u32 2147483647, %v825_v62 }
 0x136   : > { %v1079_v22 = vmul.f32 %v1020_v15, %v2350_v19  ;;  %v1024_v23 = vsub.f32 1.0, %v1023_v21  ;;  %vm1042_vm9 = vweird.f32 %v825_v62 }
 0x137   : > { %v1049_v43 = vor.u32 1.1754944e-38, %v1048_v17  ;;  %vm1047_vm11 = vcmp.eq.f32.partialorder %v1046_v40, 8.507059e+37 }
 0x138   : > { %1155 = vmatmul.f32.gmra.mxu2 %v1079_v22  ;;  %v1025_v25 = vmul.f32 %v1909_v18, %v1024_v23 }
 0x13a   : > { %v1911_v28 = vpop.eup %1910  ;;  %v1026_v8 = vadd.f32 %v1909_v18, %v1025_v25 }
 0x13b   : > { %v1913_v29 = vpop.eup %1912  ;;  %v826_v30 = vadd.f32 1.0, %v1911_v28 }
 0x13c   : > { %v1030_v32 = vsel %vm1029_vm6, %v1909_v18, %v1026_v8  ;;  %v1038_v34 = vmul.f32 %v1913_v29, %v825_v62  ;;  %vm1043_vm8 = vweird.f32 %v1913_v29 }
 0x13d   : > { %1914 = vrcp.f32 %v826_v30  ;;  %v1035_v35 = vsel %vm1032_vm7, %v1034_v31, %v1030_v32  ;;  %vm1044_vm10 = vmor %vm1042_vm9, %vm1043_vm8  ;;  %v1063_v49 = vand.u32 2147483648, %v826_v30  ;;  %v1061_v50 = vand.u32 2147483647, %v826_v30 }
 0x13e   : > { %v1080_v19 = vmul.f32 %v1035_v35, %v2355_v38  ;;  %v1039_v37 = vsub.f32 1.0, %v1038_v34  ;;  %vm1057_vm13 = vweird.f32 %v826_v30 }
 0x13f   : > { %v1064_v52 = vor.u32 1.1754944e-38, %v1063_v49  ;;  %vm1062_vm15 = vcmp.eq.f32.partialorder %v1061_v50, 8.507059e+37 }
 0x140   : > { %1158 = vmatmul.f32.gmra.mxu2 %v1080_v19  ;;  %v1040_v39 = vmul.f32 %v1913_v29, %v1039_v37 }
 0x142   : > { %v1041_v41 = vadd.f32 %v1913_v29, %v1040_v39 }
 0x143   : > { %v1915_v42 = vpop.eup %1914 }
 0x144   : > { %v1045_v45 = vsel %vm1044_vm10, %v1913_v29, %v1041_v41  ;;  %v1053_v33 = vmul.f32 %v1915_v42, %v826_v30  ;;  %vm1058_vm12 = vweird.f32 %v1915_v42 }
 0x145   : > { %v1050_v47 = vsel %vm1047_vm11, %v1049_v43, %v1045_v45  ;;  %vm1059_vm14 = vmor %vm1057_vm13, %vm1058_vm12 }
 0x146   : > { %v1081_v27 = vmul.f32 %v1050_v47, %v2360_v56  ;;  %v1054_v48 = vsub.f32 1.0, %v1053_v33 }
 0x148   : > { %1161 = vmatmul.f32.gmra.mxu2 %v1081_v27  ;;  %v1055_v38 = vmul.f32 %v1915_v42, %v1054_v48 }
 0x14a   : > { %v1056_v51 = vadd.f32 %v1915_v42, %v1055_v38 }
 0x14c   : > { %v1060_v53 = vsel %vm1059_vm14, %v1915_v42, %v1056_v51 }
 0x14d   : > { %v1065_v55 = vsel %vm1062_vm15, %v1064_v52, %v1060_v53 }
 0x14e   : > { %v1082_v36 = vmul.f32 %v1065_v55, %v2365_v10 }
 0x150   : > { %1164 = vmatmul.f32.gmra.mxu2 %v1082_v36 }
 0x15b   : > { %v1120_v57 = vpop.f32.mrf.mxu2 }
 0x15c   : > { %v2378_v3 = vadd.f32 %v2375_v2, %v1120_v57 }
 0x15e   : > { %3065 = vst [vmem:[#allocation3_spill] sm:$0xff] %v2378_v3  ;;  %v1813_v5 = vmul.f32 -1.442695, %v2378_v3 }
 0x160   : > { %1916 = vpow2.f32 %v1813_v5 }
 0x163   : > { %v1123_v58 = vpop.f32.mrf.mxu2 }
 0x164   : > { %v2382_v6 = vadd.f32 %v2375_v2, %v1123_v58 }
 0x166   : > { %3066 = vst [vmem:[#allocation4_spill] sm:$0xff] %v2382_v6  ;;  %v1814_v7 = vmul.f32 -1.442695, %v2382_v6  ;;  %v1917_v54 = vpop.eup %1916 }
 0x167   : > { %v2394_v13 = vadd.f32 1.0, %v1917_v54 }
 0x168   : > { %1918 = vpow2.f32 %v1814_v7 }
 0x169   : > { %3070 = vst [vmem:[#allocation8_spill] sm:$0xff] %v2394_v13  ;;  %1920 = vrcp.f32 %v2394_v13 }
 0x16b   : > { %v1126_v59 = vpop.f32.mrf.mxu2 }
 0x16c   : > { %v2386_v10 = vadd.f32 %v2375_v2, %v1126_v59 }
 0x16e   : > { %3067 = vst [vmem:[#allocation5_spill] sm:$0xff] %v2386_v10  ;;  %v1815_v16 = vmul.f32 -1.442695, %v2386_v10  ;;  %v1919_v0 = vpop.eup %1918 }
 0x16f   : > { %v2417_v26 = vadd.f32 1.0, %v1919_v0  ;;  %v2431_v34 = vpop.eup %1920 }
 0x170   : > { %1922 = vpow2.f32 %v1815_v16 }
 0x171   : > { %3076 = vst [vmem:[#allocation14_spill] sm:$0xff] %v2417_v26 }
 0x173   : > { %v1129_v56 = vpop.f32.mrf.mxu2 }
 0x174   : > { %v2389_v11 = vadd.f32 %v2375_v2, %v1129_v56 }
 0x176   : > { %3068 = vst [vmem:[#allocation6_spill] sm:$0xff] %v2389_v11  ;;  %v1816_v62 = vmul.f32 -1.442695, %v2389_v11  ;;  %v1923_v37 = vpop.eup %1922 }
 0x177   : > { %v2441_v33 = vadd.f32 1.0, %v1923_v37 }
 0x178   : > { %1924 = vpow2.f32 %v1816_v62 }
 0x179   : > { %3077 = vst [vmem:[#allocation15_spill] sm:$0xff] %v2441_v33 }
 0x17b   : > { %v1132_v60 = vpop.f32.mrf.mxu2 }
 0x17c   : > { %v2392_v12 = vadd.f32 %v2375_v2, %v1132_v60 }
 0x17e   : > { %3069 = vst [vmem:[#allocation7_spill] sm:$0xff] %v2392_v12  ;;  %v1817_v21 = vmul.f32 -1.442695, %v2392_v12  ;;  %v1925_v40 = vpop.eup %1924 }
 0x17f   : > { %v2443_v27 = vadd.f32 1.0, %v1925_v40 }
 0x180   : > { %1926 = vpow2.f32 %v1817_v21 }
 0x183   : > { %v1135_v61 = vpop.f32.mrf.mxu2 }
 0x184   : > { %v2397_v14 = vadd.f32 %v2375_v2, %v1135_v61 }
 0x186   : > { %3071 = vst [vmem:[#allocation9_spill] sm:$0xff] %v2397_v14  ;;  %v1818_v22 = vmul.f32 -1.442695, %v2397_v14  ;;  %v1927_v42 = vpop.eup %1926 }
 0x187   : > { %v2447_v49 = vadd.f32 1.0, %v1927_v42 }
 0x188   : > { %1928 = vpow2.f32 %v1818_v22 }
 0x18b   : > { %v1138_v63 = vpop.f32.mrf.mxu2 }
 0x18c   : > { %v2401_v18 = vadd.f32 %v2375_v2, %v1138_v63 }
 0x18e   : > { %3072 = vst [vmem:[#allocation10_spill] sm:$0xff] %v2401_v18  ;;  %v1819_v24 = vmul.f32 -1.442695, %v2401_v18  ;;  %v1929_v45 = vpop.eup %1928 }
 0x18f   : > { %v2449_v50 = vadd.f32 1.0, %v1929_v45 }
 0x190   : > { %1930 = vpow2.f32 %v1819_v24 }
 0x191   : > { %1932 = vrcp.f32 %v2417_v26 }
 0x193   : > { %v1141_v44 = vpop.f32.mrf.mxu2 }
 0x194   : > { %v2406_v15 = vadd.f32 %v2375_v2, %v1141_v44 }
 0x196   : > { %3073 = vst [vmem:[#allocation11_spill] sm:$0xff] %v2406_v15  ;;  %v1820_v8 = vmul.f32 -1.442695, %v2406_v15  ;;  %v1931_v47 = vpop.eup %1930 }
 0x197   : > { %v2445_v48 = vpop.eup %1932  ;;  %v2452_v52 = vadd.f32 1.0, %v1931_v47 }
 0x198   : > { %1934 = vpow2.f32 %v1820_v8 }
 0x19b   : > { %v1144_v1 = vpop.f32.mrf.mxu2 }
 0x19c   : > { %v2411_v23 = vadd.f32 %v2375_v2, %v1144_v1 }
 0x19e   : > { %3074 = vst [vmem:[#allocation12_spill] sm:$0xff] %v2411_v23  ;;  %v1821_v30 = vmul.f32 -1.442695, %v2411_v23  ;;  %v1935_v38 = vpop.eup %1934 }
 0x19f   : > { %v2459_v58 = vadd.f32 1.0, %v1935_v38 }
 0x1a0   : > { %1936 = vpow2.f32 %v1821_v30 }
 0x1a3   : > { %v1147_v46 = vpop.f32.mrf.mxu2 }
 0x1a4   : > { %v2415_v25 = vadd.f32 %v2375_v2, %v1147_v46 }
 0x1a6   : > { %3075 = vst [vmem:[#allocation13_spill] sm:$0xff] %v2415_v25  ;;  %v1822_v32 = vmul.f32 -1.442695, %v2415_v25  ;;  %v1937_v51 = vpop.eup %1936 }
 0x1a7   : > { %v2462_v56 = vadd.f32 1.0, %v1937_v51 }
 0x1a8   : > { %1938 = vpow2.f32 %v1822_v32  ;;  %v1233_v32 = vmul.f32 %v2431_v34, %v2394_v13 }
 0x1ab   : > { %v1150_v4 = vpop.f32.mrf.mxu2 }
 0x1ac   : > { %v2420_v28 = vadd.f32 %v2375_v2, %v1150_v4 }
 0x1ae   : > { %v1823_v35 = vmul.f32 -1.442695, %v2420_v28  ;;  %v1939_v55 = vpop.eup %1938 }
 0x1af   : > { %v2466_v63 = vadd.f32 1.0, %v1939_v55 }
 0x1b0   : > { %1940 = vpow2.f32 %v1823_v35 }
 0x1b3   : > { %v1153_v9 = vpop.f32.mrf.mxu2 }
 0x1b4   : > { %v2424_v29 = vadd.f32 %v2375_v2, %v1153_v9 }
 0x1b6   : > { %v1824_v17 = vmul.f32 -1.442695, %v2424_v29  ;;  %v1941_v57 = vpop.eup %1940 }
 0x1b7   : > { %v2468_v1 = vadd.f32 1.0, %v1941_v57 }
 0x1b8   : > { %1942 = vpow2.f32 %v1824_v17 }
 0x1b9   : > { %vm1387_vm8 = vweird.f32 %v2468_v1 }
 0x1bb   : > { %v1156_v20 = vpop.f32.mrf.mxu2 }
 0x1bc   : > { %v2428_v31 = vadd.f32 %v2375_v2, %v1156_v20 }
 0x1be   : > { %v1825_v41 = vmul.f32 -1.442695, %v2428_v31  ;;  %v1943_v59 = vpop.eup %1942 }
 0x1bf   : > { %v2473_v4 = vadd.f32 1.0, %v1943_v59 }
 0x1c0   : > { %1944 = vpow2.f32 %v1825_v41 }
 0x1c1   : > { %vm1402_vm4 = vweird.f32 %v2473_v4 }
 0x1c3   : > { %v1159_v19 = vpop.f32.mrf.mxu2 }
 0x1c4   : > { %v2437_v39 = vadd.f32 %v2375_v2, %v1159_v19  ;;  %v1248_v19 = vmul.f32 %v2445_v48, %v2417_v26 }
 0x1c6   : > { %v1826_v43 = vmul.f32 -1.442695, %v2437_v39  ;;  %v1945_v61 = vpop.eup %1944 }
 0x1c7   : > { %v2478_v7 = vadd.f32 1.0, %v1945_v61 }
 0x1c8   : > { %1946 = vpow2.f32 %v1826_v43  ;;  %v1234_v43 = vsub.f32 1.0, %v1233_v32 }
 0x1c9   : > { %1948 = vrcp.f32 %v2441_v33  ;;  %vm1417_vm1 = vweird.f32 %v2478_v7 }
 0x1ca   : > { %1950 = vrcp.f32 %v2443_v27  ;;  %v2553_v23 = vmul.f32 %v2431_v34, %v1234_v43 }
 0x1cb   : > { %v1162_v53 = vpop.f32.mrf.mxu2  ;;  %1952 = vrcp.f32 %v2447_v49 }
 0x1cc   : > { %v2456_v36 = vadd.f32 %v2375_v2, %v1162_v53  ;;  %1954 = vrcp.f32 %v2449_v50  ;;  %v1249_v53 = vsub.f32 1.0, %v1248_v19 }
 0x1cd   : > { %1956 = vrcp.f32 %v2452_v52 }
 0x1ce   : > { %v1827_v60 = vmul.f32 -1.442695, %v2456_v36  ;;  %v1947_v44 = vpop.eup %1946 }
 0x1cf   : > { %v2470_v46 = vpop.eup %1948  ;;  %v2483_v54 = vadd.f32 1.0, %v1947_v44 }
 0x1d0   : > { %1958 = vpow2.f32 %v1827_v60  ;;  %v2475_v5 = vpop.eup %1950  ;;  %v1263_v40 = vmul.f32 %v2470_v46, %v2441_v33 }
 0x1d1   : > { %1960 = vrcp.f32 %v2459_v58  ;;  %v2480_v9 = vpop.eup %1952  ;;  %v1278_v42 = vmul.f32 %v2475_v5, %v2443_v27  ;;  %vm1432_vm11 = vweird.f32 %v2483_v54 }
 0x1d2   : > { %1962 = vrcp.f32 %v2462_v56  ;;  %v2485_v62 = vpop.eup %1954  ;;  %v1293_v51 = vmul.f32 %v2480_v9, %v2447_v49 }
 0x1d3   : > { %1964 = vrcp.f32 %v2466_v63  ;;  %v1165_v16 = vpop.f32.mrf.mxu2  ;;  %v2491_v0 = vpop.eup %1956  ;;  %v1308_v38 = vmul.f32 %v2485_v62, %v2449_v50 }
 0x1d4   : > { %1966 = vrcp.f32 %v2468_v1  ;;  %v2489_v20 = vadd.f32 %v2375_v2, %v1165_v16  ;;  %v1323_v47 = vmul.f32 %v2491_v0, %v2452_v52  ;;  %v1294_v11 = vsub.f32 1.0, %v1293_v51 }
 0x1d5   : > { %1968 = vrcp.f32 %v2473_v4  ;;  %v1309_v10 = vsub.f32 1.0, %v1308_v38 }
 0x1d6   : > { %v1959_v21 = vpop.eup %1958  ;;  %1970 = vrcp.f32 %v2478_v7  ;;  %v1828_v22 = vmul.f32 -1.442695, %v2489_v20  ;;  %v1324_v6 = vsub.f32 1.0, %v1323_v47 }
 0x1d7   : > { %v2496_v24 = vpop.eup %1960  ;;  %1972 = vrcp.f32 %v2483_v54  ;;  %v2499_v8 = vadd.f32 1.0, %v1959_v21  ;;  %v2566_v51 = vmul.f32 %v2485_v62, %v1309_v10 }
 0x1d8   : > { %v2501_v30 = vpop.eup %1962  ;;  %1974 = vpow2.f32 %v1828_v22  ;;  %v1338_v61 = vmul.f32 %v2496_v24, %v2459_v58  ;;  %v1264_v22 = vsub.f32 1.0, %v1263_v40  ;;  %v2550_v40 = vmul.f32 %v2445_v48, %v1249_v53 }
 0x1d9   : > { %v2503_v2 = vpop.eup %1964  ;;  %1976 = vrcp.f32 %v2499_v8  ;;  %v1353_v60 = vmul.f32 %v2501_v30, %v2462_v56  ;;  %v2563_v38 = vmul.f32 %v2491_v0, %v1324_v6  ;;  %v2569_v53 = vmul.f32 %v2480_v9, %v1294_v11 }
 0x1da   : > { %v2508_v35 = vpop.eup %1966  ;;  %v1368_v59 = vmul.f32 %v2503_v2, %v2466_v63  ;;  %v1339_v18 = vsub.f32 1.0, %v1338_v61  ;;  %vm1447_vm6 = vweird.f32 %v2499_v8  ;;  %vm1373_vm9 = vweird.f32 %v2503_v2 }
 0x1db   : > { %v2512_v37 = vpop.eup %1968  ;;  %v1383_v21 = vmul.f32 %v2508_v35, %v2468_v1  ;;  %v1354_v14 = vsub.f32 1.0, %v1353_v60  ;;  %vm1388_vm5 = vweird.f32 %v2508_v35  ;;  %vm1343_vm15 = vweird.f32 %v2496_v24 }
 0x1dc   : > { %v2514_v17 = vpop.eup %1970  ;;  %v1398_v19 = vmul.f32 %v2512_v37, %v2473_v4  ;;  %v1369_v12 = vsub.f32 1.0, %v1368_v59  ;;  %vm1403_vm0 = vweird.f32 %v2512_v37 }
 0x1dd   : > { %v2518_v41 = vpop.eup %1972  ;;  %v1413_v32 = vmul.f32 %v2514_v17, %v2478_v7  ;;  %v1384_v13 = vsub.f32 1.0, %v1383_v21  ;;  %v2576_v61 = vmul.f32 %v2501_v30, %v1354_v14  ;;  %vm1418_vm12 = vweird.f32 %v2514_v17 }
 0x1de   : > { %v1975_v45 = vpop.eup %1974  ;;  %v1428_v16 = vmul.f32 %v2518_v41, %v2483_v54  ;;  %v1399_v25 = vsub.f32 1.0, %v1398_v19  ;;  %v2573_v60 = vmul.f32 %v2503_v2, %v1369_v12  ;;  %v1421_v12 = vand.u32 2147483647, %v2478_v7 }
 0x1df   : > { %v2528_v55 = vpop.eup %1976  ;;  %v2530_v57 = vadd.f32 1.0, %v1975_v45  ;;  %v1279_v45 = vsub.f32 1.0, %v1278_v42  ;;  %v1414_v26 = vsub.f32 1.0, %v1413_v32  ;;  %v2559_v42 = vmul.f32 %v2470_v46, %v1264_v22 }
 0x1e0   : > { %v1443_v44 = vmul.f32 %v2528_v55, %v2499_v8  ;;  %v1429_v15 = vsub.f32 1.0, %v1428_v16  ;;  %v1385_v11 = vmul.f32 %v2508_v35, %v1384_v13  ;;  %v1400_v14 = vmul.f32 %v2512_v37, %v1399_v25 }
 0x1e1   : > { %1978 = vrcp.f32 %v2530_v57  ;;  %v2556_v33 = vmul.f32 %v2475_v5, %v1279_v45  ;;  %vm1448_vm2 = vweird.f32 %v2528_v55  ;;  %vm1433_vm3 = vweird.f32 %v2518_v41 }
 0x1e2   : > { %v1444_v3 = vsub.f32 1.0, %v1443_v44  ;;  %v1430_v10 = vmul.f32 %v2518_v41, %v1429_v15  ;;  %v1415_v44 = vmul.f32 %v2514_v17, %v1414_v26  ;;  %v1468_v13 = vand.u32 2147483648, %v2530_v57  ;;  %vm2602_vm10 = vmor %vm1447_vm6, %vm1448_vm2 }
 0x1e3   : > { %v1451_v15 = vand.u32 2147483647, %v2499_v8  ;;  %v1453_v26 = vand.u32 2147483648, %v2499_v8  ;;  %v1466_v21 = vand.u32 2147483647, %v2530_v57  ;;  %v1438_v8 = vand.u32 2147483648, %v2483_v54  ;;  %vm2616_vm14 = vmor %vm1432_vm11, %vm1433_vm3 }
 0x1e4   : > { %v1445_v47 = vmul.f32 %v2528_v55, %v1444_v3  ;;  %v2579_v3 = vmul.f32 %v2496_v24, %v1339_v18  ;;  %v1431_v22 = vadd.f32 %v2518_v41, %v1430_v10  ;;  %v1436_v19 = vand.u32 2147483647, %v2483_v54 }
 0x1e5   : > { %vm1462_vm13 = vweird.f32 %v2530_v57  ;;  %v1416_v10 = vadd.f32 %v2514_v17, %v1415_v44  ;;  %vm1358_vm2 = vweird.f32 %v2501_v30  ;;  %v1469_v54 = vor.u32 1.1754944e-38, %v1468_v13 }
 0x1e6   : > { %v1446_v18 = vadd.f32 %v2528_v55, %v1445_v47  ;;  %vm1452_vm3 = vcmp.eq.f32.partialorder %v1451_v15, 8.507059e+37  ;;  %vm1357_vm11 = vweird.f32 %v2462_v56  ;;  %v1439_v59 = vor.u32 1.1754944e-38, %v1438_v8 }
 0x1e7   : > { %v1979_v43 = vpop.eup %1978  ;;  %v1386_v15 = vadd.f32 %v2508_v35, %v1385_v11 }
 0x1e8   : > { %v1458_v6 = vmul.f32 %v1979_v43, %v2530_v57  ;;  %vm1463_vm7 = vweird.f32 %v1979_v43  ;;  %v1450_v47 = vsel %vm2602_vm10, %v2528_v55, %v1446_v18  ;;  %v1454_v57 = vor.u32 1.1754944e-38, %v1453_v26 }
 0x1e9   : > { %vm1464_vm6 = vmor %vm1462_vm13, %vm1463_vm7  ;;  %v1401_v55 = vadd.f32 %v2512_v37, %v1400_v14  ;;  %vm1467_vm10 = vcmp.eq.f32.partialorder %v1466_v21, 8.507059e+37  ;;  %vm1437_vm13 = vcmp.eq.f32.partialorder %v1436_v19, 8.507059e+37  ;;  %v1296_v21 = vadd.f32 %v2480_v9, %v2569_v53  ;;  %v3103_v53 = vld [vmem:[#allocation12_spill] sm:$0xff] }
 0x1ea   : > { %v1459_v16 = vsub.f32 1.0, %v1458_v6  ;;  %v1455_v32 = vsel %vm1452_vm3, %v1454_v57, %v1450_v47  ;;  %vm2635_vm7 = vmor %vm1417_vm1, %vm1418_vm12  ;;  %vm1422_vm12 = vcmp.eq.f32.partialorder %v1421_v12, 8.507059e+37  ;;  %v1376_v12 = vand.u32 2147483647, %v2466_v63 }
 0x1eb   : > { %vm2651_vm1 = vmor %vm1402_vm4, %vm1403_vm0  ;;  %v1486_v11 = vmul.f32 %v1455_v32, %v2456_v36  ;;  %vm1327_vm0 = vweird.f32 %v2452_v52  ;;  %vm1313_vm4 = vweird.f32 %v2485_v62  ;;  %v1341_v57 = vadd.f32 %v2496_v24, %v2579_v3 }
 0x1ec   : > { %v1460_v25 = vmul.f32 %v1979_v43, %v1459_v16  ;;  %v1423_v16 = vand.u32 2147483648, %v2478_v7  ;;  %v1331_v32 = vand.u32 2147483647, %v2452_v52 }
 0x1ee   : > { %v1461_v45 = vadd.f32 %v1979_v43, %v1460_v25  ;;  %v1435_v25 = vsel %vm2616_vm14, %v2518_v41, %v1431_v22  ;;  %v1420_v41 = vsel %vm2635_vm7, %v2514_v17, %v1416_v10  ;;  %vm1342_vm14 = vweird.f32 %v2459_v58 }
 0x1ef   : > { %v1440_v7 = vsel %vm1437_vm13, %v1439_v59, %v1435_v25  ;;  %v1424_v26 = vor.u32 1.1754944e-38, %v1423_v16  ;;  %v1393_v17 = vand.u32 2147483648, %v2468_v1  ;;  %v1405_v59 = vsel %vm2651_vm1, %v2512_v37, %v1401_v55 }
 0x1f0   : > { %v1465_v18 = vsel %vm1464_vm6, %v1979_v43, %v1461_v45  ;;  %v1408_v43 = vand.u32 2147483648, %v2473_v4  ;;  %vm1328_vm6 = vweird.f32 %v2491_v0  ;;  %v1371_v22 = vadd.f32 %v2503_v2, %v2573_v60 }
 0x1f1   : > { %v1470_v44 = vsel %vm1467_vm10, %v1469_v54, %v1465_v18  ;;  %v1425_v19 = vsel %vm1422_vm12, %v1424_v26, %v1420_v41  ;;  %vm2669_vm10 = vmor %vm1387_vm8, %vm1388_vm5  ;;  %v1378_v37 = vand.u32 2147483648, %v2466_v63  ;;  %v1485_v60 = vmul.f32 %v1440_v7, %v2437_v39 }
 0x1f2   : > { %v1487_v13 = vmul.f32 %v1470_v44, %v2489_v20  ;;  %v1391_v20 = vand.u32 2147483647, %v2468_v1  ;;  %v1409_v8 = vor.u32 1.1754944e-38, %v1408_v43  ;;  %v3088_v45 = vand.u32 2147483647, %v2473_v4 }
 0x1f3   : > { %v1390_v47 = vsel %vm2669_vm10, %v2508_v35, %v1386_v15  ;;  %v1356_v1 = vadd.f32 %v2501_v30, %v2576_v61  ;;  %vm1312_vm5 = vweird.f32 %v2449_v50  ;;  %vm1298_vm8 = vweird.f32 %v2480_v9  ;;  %vm2707_vm10 = vmor %vm1357_vm11, %vm1358_vm2 }
 0x1f4   : > { %1501 = vmatpush.msra.mxu3 %v1487_v13  ;;  %vm1407_vm3 = vcmp.eq.f32.partialorder %v3088_v45, 8.507059e+37  ;;  %v1394_v10 = vor.u32 1.1754944e-38, %v1393_v17  ;;  %vm3089_vm7 = vweird.f32 %v2466_v63  ;;  %v1361_v4 = vand.u32 2147483647, %v2462_v56 }
 0x1f5   : > { %v1410_v6 = vsel %vm1407_vm3, %v1409_v8, %v1405_v59  ;;  %vm2689_vm13 = vmor %vm3089_vm7, %vm1373_vm9  ;;  %v1363_v35 = vand.u32 2147483648, %v2462_v56  ;;  %v1484_v61 = vmul.f32 %v1425_v19, %v2428_v31  ;;  %vm1392_vm1 = vcmp.eq.f32.partialorder %v1391_v20, 8.507059e+37  ;;  %v3113_v31 = vld [vmem:[#allocation9_spill] sm:$0xff] }
 0x1f6   : > { %1502 = vmatpush.msra.mxu3 %v1486_v11  ;;  %v1375_v54 = vsel %vm2689_vm13, %v2503_v2, %v1371_v22  ;;  %vm1297_vm9 = vweird.f32 %v2447_v49  ;;  %vm1283_vm12 = vweird.f32 %v2475_v5  ;;  %v1395_v63 = vsel %vm1392_vm1, %v1394_v10, %v1390_v47  ;;  %vm2725_vm7 = vmor %vm1342_vm14, %vm1343_vm15 }
 0x1f7   : > { %v1379_v16 = vor.u32 1.1754944e-38, %v1378_v37  ;;  %v1346_v55 = vand.u32 2147483647, %v2459_v58  ;;  %v1348_v2 = vand.u32 2147483648, %v2459_v58  ;;  %v1483_v3 = vmul.f32 %v1410_v6, %v2424_v29  ;;  %v3096_v58 = vld [vmem:[#allocation15_spill] sm:$0xff]  ;;  %vm2743_vm1 = vmor %vm1327_vm0, %vm1328_vm6 }
 0x1f8   : > { %1503 = vmatpush.msra.mxu3 %v1485_v60  ;;  %vm1377_vm3 = vcmp.eq.f32.partialorder %v1376_v12, 8.507059e+37  ;;  %v1360_v18 = vsel %vm2707_vm10, %v2501_v30, %v1356_v1  ;;  %v1326_v25 = vadd.f32 %v2491_v0, %v2563_v38  ;;  %vm1282_vm2 = vweird.f32 %v2443_v27 }
 0x1f9   : > { %vm1268_vm11 = vweird.f32 %v2470_v46  ;;  %v1380_v56 = vsel %vm1377_vm3, %v1379_v16, %v1375_v54  ;;  %v1364_v44 = vor.u32 1.1754944e-38, %v1363_v35  ;;  %v1333_v30 = vand.u32 2147483648, %v2452_v52  ;;  %v3100_v52 = vld [vmem:[#allocation14_spill] sm:$0xff]  ;;  %vm2761_vm3 = vmor %vm1312_vm5, %vm1313_vm4 }
 0x1fa   : > { %1504 = vmatpush.msra.mxu3 %v1484_v61  ;;  %v1482_v38 = vmul.f32 %v1395_v63, %v2420_v28  ;;  %vm1362_vm13 = vcmp.eq.f32.partialorder %v1361_v4, 8.507059e+37  ;;  %v1345_v14 = vsel %vm2725_vm7, %v2496_v24, %v1341_v57  ;;  %v1311_v43 = vadd.f32 %v2485_v62, %v2566_v51  ;;  %v3099_v51 = vld [vmem:[#allocation13_spill] sm:$0xff]  ;;  %vm2778_vm5 = vmor %vm1297_vm9, %vm1298_vm8  ;;  %v3110_v35 = vld [vmem:[#allocation10_spill] sm:$0xff] }
 0x1fb   : > { %vm1267_vm15 = vweird.f32 %v3096_v58  ;;  %vm1253_vm14 = vweird.f32 %v2445_v48  ;;  %v1365_v13 = vsel %vm1362_vm13, %v1364_v44, %v1360_v18  ;;  %v1349_v41 = vor.u32 1.1754944e-38, %v1348_v2  ;;  %vm2794_vm8 = vmor %vm1282_vm2, %vm1283_vm12  ;;  %v3116_v44 = vld [vmem:[#allocation7_spill] sm:$0xff] }
 0x1fc   : > { %1505 = vmatpush.msra.mxu3 %v1483_v3  ;;  %v1316_v15 = vand.u32 2147483647, %v2449_v50  ;;  %v1318_v24 = vand.u32 2147483648, %v2449_v50  ;;  %v1481_v7 = vmul.f32 %v1380_v56, %v3099_v51  ;;  %vm1347_vm10 = vcmp.eq.f32.partialorder %v1346_v55, 8.507059e+37  ;;  %v3104_v50 = vld [vmem:[#allocation8_spill] sm:$0xff]  ;;  %vm2810_vm12 = vmor %vm1267_vm15, %vm1268_vm11 }
 0x1fd   : > { %v1330_v26 = vsel %vm2743_vm1, %v2491_v0, %v1326_v25  ;;  %vm1252_vm6 = vweird.f32 %v3100_v52  ;;  %vm1238_vm0 = vweird.f32 %v2431_v34  ;;  %v1350_v20 = vsel %vm1347_vm10, %v1349_v41, %v1345_v14  ;;  %v3118_v41 = vld [vmem:[#allocation5_spill] sm:$0xff]  ;;  %v3121_v51 = vld [vmem:[#allocation4_spill] sm:$0xff] }
 0x1fe   : > { %1506 = vmatpush.msra.mxu3 %v1482_v38  ;;  %v1334_v17 = vor.u32 1.1754944e-38, %v1333_v30  ;;  %v1301_v59 = vand.u32 2147483647, %v2447_v49  ;;  %v1303_v0 = vand.u32 2147483648, %v2447_v49  ;;  %v1480_v22 = vmul.f32 %v1365_v13, %v3103_v53  ;;  %vm2826_vm11 = vmor %vm1252_vm6, %vm1253_vm14  ;;  %v3117_v38 = vld [vmem:[#allocation6_spill] sm:$0xff] }
 0x1ff   : > { %vm1332_vm7 = vcmp.eq.f32.partialorder %v1331_v32, 8.507059e+37  ;;  %v1315_v19 = vsel %vm2761_vm3, %v2485_v62, %v1311_v43  ;;  %v1281_v8 = vadd.f32 %v2475_v5, %v2556_v33  ;;  %vm1237_vm4 = vweird.f32 %v3104_v50  ;;  %v3107_v62 = vld [vmem:[#allocation11_spill] sm:$0xff] }
 0x200   : > { %1507 = vmatpush.msra.mxu3 %v1481_v7  ;;  %v1335_v36 = vsel %vm1332_vm7, %v1334_v17, %v1330_v26  ;;  %v1319_v12 = vor.u32 1.1754944e-38, %v1318_v24  ;;  %v1286_v60 = vand.u32 2147483647, %v2443_v27  ;;  %v1288_v45 = vand.u32 2147483648, %v2443_v27  ;;  %vm1239_vm14 = vmor %vm1237_vm4, %vm1238_vm0  ;;  %v3122_v26 = vld [vmem:[#allocation3_spill] sm:$0xff] }
 0x201   : > { %v1479_v47 = vmul.f32 %v1350_v20, %v3107_v62  ;;  %vm1317_vm13 = vcmp.eq.f32.partialorder %v1316_v15, 8.507059e+37  ;;  %v1300_v33 = vsel %vm2778_vm5, %v2480_v9, %v1296_v21  ;;  %v1266_v1 = vadd.f32 %v2470_v46, %v2559_v42  ;;  %v1851_v15 = vld [vmem:[%s3120_s26] ss:$0 sm:$0xff] }
 0x202   : > { %1508 = vmatpush.msra.mxu3 %v1480_v22  ;;  %v1320_v49 = vsel %vm1317_vm13, %v1319_v12, %v1315_v19  ;;  %v1304_v6 = vor.u32 1.1754944e-38, %v1303_v0  ;;  %v1271_v39 = vand.u32 2147483647, %v3096_v58  ;;  %v1273_v4 = vand.u32 2147483648, %v3096_v58  ;;  %v1499_v20 = vld [vmem:[#allocation2] sm:$0xff] }
 0x203   : > { %v1478_v9 = vmul.f32 %v1335_v36, %v3110_v35  ;;  %vm1302_vm9 = vcmp.eq.f32.partialorder %v1301_v59, 8.507059e+37  ;;  %v1285_v42 = vsel %vm2794_vm8, %v2475_v5, %v1281_v8  ;;  %v1251_v61 = vadd.f32 %v2445_v48, %v2550_v40  ;;  %v1500_v59 = vld [vmem:[#allocation2 + $0x8] sm:$0xff] }
 0x204   : > { %1509 = vmatpush.msra.mxu3 %v1479_v47  ;;  %v1305_v27 = vsel %vm1302_vm9, %v1304_v6, %v1300_v33  ;;  %v1289_v54 = vor.u32 1.1754944e-38, %v1288_v45  ;;  %v1256_v63 = vand.u32 2147483647, %v3100_v52  ;;  %v1258_v16 = vand.u32 2147483648, %v3100_v52 }
 0x205   : > { %v1477_v5 = vmul.f32 %v1320_v49, %v3113_v31  ;;  %vm1287_vm2 = vcmp.eq.f32.partialorder %v1286_v60, 8.507059e+37  ;;  %v1270_v40 = vsel %vm2810_vm12, %v2470_v46, %v1266_v1  ;;  %v1236_v55 = vadd.f32 %v2431_v34, %v2553_v23 }
 0x206   : > { %1510 = vmatpush.msra.mxu3 %v1478_v9  ;;  %v1290_v2 = vsel %vm1287_vm2, %v1289_v54, %v1285_v42  ;;  %v1274_v3 = vor.u32 1.1754944e-38, %v1273_v4  ;;  %v1241_v25 = vand.u32 2147483647, %v3104_v50  ;;  %v1243_v56 = vand.u32 2147483648, %v3104_v50 }
 0x207   : > { %v1476_v46 = vmul.f32 %v1305_v27, %v3116_v44  ;;  %vm1272_vm15 = vcmp.eq.f32.partialorder %v1271_v39, 8.507059e+37  ;;  %v1255_v23 = vsel %vm2826_vm11, %v2445_v48, %v1251_v61  ;;  %v1489_v29 = vlaneseq }
 0x208   : > { %1511 = vmatpush.msra.mxu3 %v1477_v5  ;;  %v1275_v32 = vsel %vm1272_vm15, %v1274_v3, %v1270_v40  ;;  %v1259_v30 = vor.u32 1.1754944e-38, %v1258_v16  ;;  %v1475_v14 = vmul.f32 %v1290_v2, %v3117_v38  ;;  %vm1257_vm1 = vcmp.eq.f32.partialorder %v1256_v63, 8.507059e+37 }
 0x209   : > { %v1240_v43 = vsel %vm1239_vm14, %v2431_v34, %v1236_v55  ;;  %v1244_v13 = vor.u32 1.1754944e-38, %v1243_v56  ;;  %v1474_v28 = vmul.f32 %v1275_v32, %v3118_v41  ;;  %vm1242_vm10 = vcmp.eq.f32.partialorder %v1241_v25, 8.507059e+37 }
 0x20a   : > { %1512 = vmatpush.msra.mxu3 %v1476_v46  ;;  %v1260_v58 = vsel %vm1257_vm1, %v1259_v30, %v1255_v23  ;;  %v1490_v48 = vshrl.u32 %v1489_v29, 7  ;;  %v1999_v34 = vmov 1.0  }
 0x20b   : > { %v1245_v24 = vsel %vm1242_vm10, %v1244_v13, %v1240_v43  ;;  %v1473_v7 = vmul.f32 %v1260_v58, %v3121_v51 }
 0x20c   : > { %1513 = vmatpush.msra.mxu3 %v1475_v14  ;;  %v1472_v21 = vmul.f32 %v1245_v24, %v3122_v26  ;;  %vm1493_vm6 = vcmp.eq.s32.totalorder %v1490_v48, %v1851_v15  ;;  %v1491_v52 = vadd.s32 8, %v1490_v48 }
 0x20e   : > { %1514 = vmatpush.msra.mxu3 %v1474_v28  ;;  %vm1494_vm0 = vcmp.eq.s32.totalorder %v1491_v52, %v1851_v15 }
 0x210   : > { %1515 = vmatpush.msra.mxu3 %v1473_v7 }
 0x212   : > { %1516 = vmatpush.msra.mxu3 %v1472_v21 }
 0x213   : > { %1831 = vmatmul.msk.f32.vlgmr.msra.gmra.mxu3 %vm1493_vm6, %v1999_v34 }
 0x21b   : > { %1832 = vmatmul.msk.f32.gmra.mxu3 %vm1494_vm0, %v1999_v34 }
 0x296   : > { %v1518_v17 = vpop.f32.mrf.mxu3 }
 0x297   : > { %v1524_v11 = vadd.f32 %v1518_v17, %v1499_v20 }
 0x299   : > { %1526 = vst [vmem:[#allocation2] sm:$0xff] %v1524_v11 }
 0x29d   : > { %1531 = sbr.rel (%p1833_p6) target bundleno = 1147 (0x47b), region = 88 }
 0x29e   : > { %v1521_v0 = vpop.f32.mrf.mxu3 }
 0x29f   : > { %v1525_v53 = vadd.f32 %v1521_v0, %v1500_v59 }
 0x2a1   : > { %1527 = vst [vmem:[#allocation2 + $0x8] sm:$0xff] %v1525_v53 }
 0x2a2   : > { %v1567_v22 = vld [vmem:[%s3041_s11 + $0x78] sm:$0xff]  ;;  %v1566_v8 = vld [vmem:[%s3041_s11 + $0x70] sm:$0xff]  ;;  %v1565_v36 = vld [vmem:[%s3041_s11 + $0x68] sm:$0xff]  ;;  %vm1708_vm2 = vcmask 130048  }
 0x2a3   : > { %v1549_v19 = vld [vmem:[%s3040_s10 + $0x78] sm:$0xff]  ;;  %1568 = vmatpush.msra.mxu0 %v1567_v22  ;;  %v1548_v50 = vld [vmem:[%s3040_s10 + $0x70] sm:$0xff]  ;;  %v1547_v12 = vld [vmem:[%s3040_s10 + $0x68] sm:$0xff] }
 0x2a4   : > { %1591 = vmatpush.msra.mxu1 %v1549_v19  ;;  %v1564_v37 = vld [vmem:[%s3041_s11 + $0x60] sm:$0xff]  ;;  %v1563_v45 = vld [vmem:[%s3041_s11 + $0x58] sm:$0xff]  ;;  %v1562_v47 = vld [vmem:[%s3041_s11 + $0x50] sm:$0xff] }
 0x2a5   : > { %1569 = vmatpush.msra.mxu0 %v1566_v8  ;;  %v1546_v60 = vld [vmem:[%s3040_s10 + $0x60] sm:$0xff]  ;;  %v1545_v62 = vld [vmem:[%s3040_s10 + $0x58] sm:$0xff]  ;;  %v1544_v33 = vld [vmem:[%s3040_s10 + $0x50] sm:$0xff] }
 0x2a6   : > { %1592 = vmatpush.msra.mxu1 %v1548_v50  ;;  %v1561_v1 = vld [vmem:[%s3041_s11 + $0x48] sm:$0xff]  ;;  %v1560_v6 = vld [vmem:[%s3041_s11 + $0x40] sm:$0xff]  ;;  %v1559_v39 = vld [vmem:[%s3041_s11 + $0x38] sm:$0xff] }
 0x2a7   : > { %1570 = vmatpush.msra.mxu0 %v1565_v36  ;;  %v1543_v49 = vld [vmem:[%s3040_s10 + $0x48] sm:$0xff]  ;;  %v1542_v10 = vld [vmem:[%s3040_s10 + $0x40] sm:$0xff]  ;;  %v1541_v4 = vld [vmem:[%s3040_s10 + $0x38] sm:$0xff] }
 0x2a8   : > { %1593 = vmatpush.msra.mxu1 %v1547_v12  ;;  %v1558_v35 = vld [vmem:[%s3041_s11 + $0x30] sm:$0xff]  ;;  %v1557_v42 = vld [vmem:[%s3041_s11 + $0x28] sm:$0xff]  ;;  %v1556_v27 = vld [vmem:[%s3041_s11 + $0x20] sm:$0xff] }
 0x2a9   : > { %1571 = vmatpush.msra.mxu0 %v1564_v37  ;;  %v1540_v9 = vld [vmem:[%s3040_s10 + $0x30] sm:$0xff]  ;;  %v1539_v61 = vld [vmem:[%s3040_s10 + $0x28] sm:$0xff]  ;;  %v1538_v54 = vld [vmem:[%s3040_s10 + $0x20] sm:$0xff] }
 0x2aa   : > { %1594 = vmatpush.msra.mxu1 %v1546_v60  ;;  %v1555_v57 = vld [vmem:[%s3041_s11 + $0x18] sm:$0xff]  ;;  %v1554_v16 = vld [vmem:[%s3041_s11 + $0x10] sm:$0xff]  ;;  %v1553_v5 = vld [vmem:[%s3041_s11 + $0x8] sm:$0xff] }
 0x2ab   : > { %1572 = vmatpush.msra.mxu0 %v1563_v45  ;;  %v1537_v63 = vld [vmem:[%s3040_s10 + $0x18] sm:$0xff]  ;;  %v1536_v31 = vld [vmem:[%s3040_s10 + $0x10] sm:$0xff]  ;;  %v1535_v40 = vld [vmem:[%s3040_s10 + $0x8] sm:$0xff] }
 0x2ac   : > { %1595 = vmatpush.msra.mxu1 %v1545_v62  ;;  %v1552_v55 = vld [vmem:[%s3041_s11] sm:$0xff]  ;;  %v1551_v25 = vld [vmem:[#allocation2 + $0x8] sm:$0xff]  ;;  %v1675_v44 = vld [vmem:[%s3043_s13 + $0x78] sm:$0xff] }
 0x2ad   : > { %1573 = vmatpush.msra.mxu0 %v1562_v47  ;;  %v1534_v2 = vld [vmem:[%s3040_s10] sm:$0xff]  ;;  %v2956_v56 = vld [vmem:[%s3033_s3 + $0x8] sm:$0xff]  ;;  %1680 = vmatpush.msra.mxu2 %v1675_v44  ;;  %v1674_v46 = vld [vmem:[%s3043_s13 + $0x70] sm:$0xff] }
 0x2ae   : > { %1596 = vmatpush.msra.mxu1 %v1544_v33  ;;  %v1550_v3 = vld [vmem:[#allocation2] sm:$0xff]  ;;  %v1673_v23 = vld [vmem:[%s3043_s13 + $0x68] sm:$0xff]  ;;  %v1671_v32 = vld [vmem:[%s3043_s13 + $0x58] sm:$0xff] }
 0x2af   : > { %1574 = vmatpush.msra.mxu0 %v1561_v1  ;;  %v2950_v18 = vld [vmem:[%s3033_s3] sm:$0xff]  ;;  %1681 = vmatpush.msra.mxu2 %v1674_v46  ;;  %v1670_v30 = vld [vmem:[%s3043_s13 + $0x50] sm:$0xff]  ;;  %v1669_v38 = vld [vmem:[%s3043_s13 + $0x48] sm:$0xff] }
 0x2b0   : > { %1597 = vmatpush.msra.mxu1 %v1543_v49  ;;  %v1672_v29 = vld [vmem:[%s3043_s13 + $0x60] sm:$0xff]  ;;  %v1667_v43 = vld [vmem:[%s3043_s13 + $0x38] sm:$0xff]  ;;  %v1666_v58 = vld [vmem:[%s3043_s13 + $0x30] sm:$0xff] }
 0x2b1   : > { %1575 = vmatpush.msra.mxu0 %v1560_v6  ;;  %1682 = vmatpush.msra.mxu2 %v1673_v23  ;;  %v1668_v14 = vld [vmem:[%s3043_s13 + $0x40] sm:$0xff]  ;;  %v1665_v13 = vld [vmem:[%s3043_s13 + $0x28] sm:$0xff]  ;;  %v1663_v28 = vld [vmem:[%s3043_s13 + $0x18] sm:$0xff] }
 0x2b2   : > { %1598 = vmatpush.msra.mxu1 %v1542_v10  ;;  %v1664_v41 = vld [vmem:[%s3043_s13 + $0x20] sm:$0xff]  ;;  %v1662_v48 = vld [vmem:[%s3043_s13 + $0x10] sm:$0xff]  ;;  %v1661_v15 = vld [vmem:[%s3043_s13 + $0x8] sm:$0xff] }
 0x2b3   : > { %1576 = vmatpush.msra.mxu0 %v1559_v39  ;;  %1683 = vmatpush.msra.mxu2 %v1672_v29  ;;  %v1980_v24 = vld [vmem:[%s3042_s12] ss:$0 sm:$0xff] }
 0x2b4   : > { %1599 = vmatpush.msra.mxu1 %v1541_v4  ;;  %v1660_v51 = vld [vmem:[%s3043_s13] sm:$0xff] }
 0x2b5   : > { %1577 = vmatpush.msra.mxu0 %v1558_v35  ;;  %1684 = vmatpush.msra.mxu2 %v1671_v32 }
 0x2b6   : > { %1600 = vmatpush.msra.mxu1 %v1540_v9 }
 0x2b7   : > { %1578 = vmatpush.msra.mxu0 %v1557_v42  ;;  %1685 = vmatpush.msra.mxu2 %v1670_v30 }
 0x2b8   : > { %1601 = vmatpush.msra.mxu1 %v1539_v61 }
 0x2b9   : > { %1579 = vmatpush.msra.mxu0 %v1556_v27  ;;  %1686 = vmatpush.msra.mxu2 %v1669_v38 }
 0x2ba   : > { %1602 = vmatpush.msra.mxu1 %v1538_v54 }
 0x2bb   : > { %1580 = vmatpush.msra.mxu0 %v1555_v57  ;;  %1687 = vmatpush.msra.mxu2 %v1668_v14 }
 0x2bc   : > { %1603 = vmatpush.msra.mxu1 %v1537_v63  ;;  %v1981_v63 = vld [vmem:[%s3044_s14] ss:$0 sm:$0xff] }
 0x2bd   : > { %1581 = vmatpush.msra.mxu0 %v1554_v16  ;;  %1688 = vmatpush.msra.mxu2 %v1667_v43 }
 0x2be   : > { %1604 = vmatpush.msra.mxu1 %v1536_v31 }
 0x2bf   : > { %1582 = vmatpush.msra.mxu0 %v1553_v5  ;;  %1689 = vmatpush.msra.mxu2 %v1666_v58 }
 0x2c0   : > { %1605 = vmatpush.msra.mxu1 %v1535_v40 }
 0x2c1   : > { %1583 = vmatpush.msra.mxu0 %v1552_v55  ;;  %1690 = vmatpush.msra.mxu2 %v1665_v13 }
 0x2c2   : > { %1606 = vmatpush.msra.mxu1 %v1534_v2  ;;  %1584 = vmatmul.f32.vlgmr.msra.gmra.mxu0 %v1550_v3  ;;  %v1707_v3 = vld [vmem:[%s3034_s4] sm:$0xff] }
 0x2c3   : > { %1607 = vmatmul.f32.vlgmr.msra.gmra.mxu1 %v2950_v18  ;;  %1691 = vmatpush.msra.mxu2 %v1664_v41 }
 0x2c5   : > { %1692 = vmatpush.msra.mxu2 %v1663_v28 }
 0x2c7   : > { %1693 = vmatpush.msra.mxu2 %v1662_v48 }
 0x2c9   : > { %1694 = vmatpush.msra.mxu2 %v1661_v15 }
 0x2ca   : > { %1587 = vmatmul.f32.gmra.mxu0 %v1551_v25 }
 0x2cb   : > { %1610 = vmatmul.f32.gmra.mxu1 %v2956_v56  ;;  %1695 = vmatpush.msra.mxu2 %v1660_v51 }
 0x33f   : > { %v1585_v7 = vpop.f32.mrf.mxu0 }
 0x340   : > { %v1608_v26 = vpop.f32.mrf.mxu1 }
 0x341   : > { %v1609_v21 = vadd.f32 %v1608_v26, %v1585_v7 }
 0x343   : > { %v1618_v34 = vadd.f32 %v1980_v24, %v1609_v21 }
 0x345   : > { %v1834_v52 = vmul.f32 -1.442695, %v1618_v34 }
 0x347   : > { %1982 = vpow2.f32 %v1834_v52  ;;  %v1588_v20 = vpop.f32.mrf.mxu0 }
 0x348   : > { %v1611_v17 = vpop.f32.mrf.mxu1 }
 0x349   : > { %v1612_v11 = vadd.f32 %v1611_v17, %v1588_v20 }
 0x34b   : > { %v1619_v59 = vadd.f32 %v1980_v24, %v1612_v11 }
 0x34d   : > { %v1983_v0 = vpop.eup %1982  ;;  %v1835_v53 = vmul.f32 -1.442695, %v1619_v59 }
 0x34e   : > { %v1626_v22 = vadd.f32 1.0, %v1983_v0 }
 0x34f   : > { %1984 = vpow2.f32 %v1835_v53 }
 0x350   : > { %1986 = vrcp.f32 %v1626_v22  ;;  %v1639_v37 = vand.u32 2147483648, %v1626_v22  ;;  %v1637_v45 = vand.u32 2147483647, %v1626_v22  ;;  %vm1633_vm7 = vweird.f32 %v1626_v22 }
 0x352   : > { %v1640_v33 = vor.u32 1.1754944e-38, %v1639_v37  ;;  %vm1638_vm5 = vcmp.eq.f32.partialorder %v1637_v45, 8.507059e+37 }
 0x355   : > { %v1985_v19 = vpop.eup %1984 }
 0x356   : > { %v1987_v8 = vpop.eup %1986  ;;  %v1627_v50 = vadd.f32 1.0, %v1985_v19 }
 0x357   : > { %v1629_v36 = vmul.f32 %v1987_v8, %v1626_v22  ;;  %vm1634_vm3 = vweird.f32 %v1987_v8 }
 0x358   : > { %1988 = vrcp.f32 %v1627_v50  ;;  %vm1635_vm4 = vmor %vm1633_vm7, %vm1634_vm3  ;;  %v1654_v4 = vand.u32 2147483648, %v1627_v50  ;;  %v1652_v9 = vand.u32 2147483647, %v1627_v50  ;;  %vm1648_vm8 = vweird.f32 %v1627_v50 }
 0x359   : > { %v1630_v12 = vsub.f32 1.0, %v1629_v36 }
 0x35a   : > { %v1655_v61 = vor.u32 1.1754944e-38, %v1654_v4  ;;  %vm1653_vm12 = vcmp.eq.f32.partialorder %v1652_v9, 8.507059e+37 }
 0x35b   : > { %v1631_v60 = vmul.f32 %v1987_v8, %v1630_v12 }
 0x35d   : > { %v1632_v62 = vadd.f32 %v1987_v8, %v1631_v60 }
 0x35e   : > { %v1989_v47 = vpop.eup %1988 }
 0x35f   : > { %v1636_v1 = vsel %vm1635_vm4, %v1987_v8, %v1632_v62  ;;  %v1644_v49 = vmul.f32 %v1989_v47, %v1627_v50  ;;  %vm1649_vm13 = vweird.f32 %v1989_v47 }
 0x360   : > { %v1641_v6 = vsel %vm1638_vm5, %v1640_v33, %v1636_v1  ;;  %vm1650_vm9 = vmor %vm1648_vm8, %vm1649_vm13 }
 0x361   : > { %v1658_v10 = vmul.f32 %v1641_v6, %v1618_v34  ;;  %v1645_v39 = vsub.f32 1.0, %v1644_v49 }
 0x363   : > { %1696 = vmatmul.f32.vlgmr.msra.gmra.mxu2 %v1658_v10  ;;  %v1646_v35 = vmul.f32 %v1989_v47, %v1645_v39 }
 0x365   : > { %v1647_v42 = vadd.f32 %v1989_v47, %v1646_v35 }
 0x367   : > { %v1651_v27 = vsel %vm1650_vm9, %v1989_v47, %v1647_v42 }
 0x368   : > { %v1656_v54 = vsel %vm1653_vm12, %v1655_v61, %v1651_v27 }
 0x369   : > { %v1659_v57 = vmul.f32 %v1656_v54, %v1619_v59 }
 0x36b   : > { %1699 = vmatmul.f32.gmra.mxu2 %v1659_v57 }
 0x3e6   : > { %v1697_v16 = vpop.f32.mrf.mxu2 }
 0x3e7   : > { %v1698_v31 = vadd.f32 %v1981_v63, %v1697_v16 }
 0x3e9   : > { %v1703_v5 = vadd.f32 %v1698_v31, %v2950_v18 }
 0x3eb   : > { %1705 = vst [vmem:[%s3045_s15] sm:$0xff] %v1703_v5 }
 0x3ee   : > { %v1700_v40 = vpop.f32.mrf.mxu2 }
 0x3ef   : > { %v1701_v55 = vadd.f32 %v1981_v63, %v1700_v40 }
 0x3f1   : > { %v1704_v2 = vadd.f32 %v1701_v55, %v2956_v56 }
 0x3f3   : > { %1706 = vst [vmem:[%s3045_s15 + $0x8] sm:$0xff] %v1704_v2  ;;  %1726 = vmatpush.msra.mxu3 %v1704_v2 }
 0x3f5   : > { %1727 = vmatpush.msra.mxu3 %v1703_v5 }
 0x3f6   : > { %1836 = vmatmul.msk.f32.vlgmr.msra.gmra.mxu3 %vm1708_vm2, %v1707_v3 }
 0x479   : > { %v1729_v18 = vpop.f32.mrf.mxu3 }
 0x47a   : > { %1732 = vst [vmem:[%s3046_s16] sm:$0xff] %v1729_v18 }
 0x47b PF: > { %s27_s21 = sadd.s32 1, %s1996_s21  }
 0x47c   : > { %p24_p7 = scmp.ge.s32.totalorder %s27_s21, 4  }
 0x47e   :  { %26 = sbr.rel (!%p24_p7) target bundleno = 2 (0x2), region = 128 }

</bundles_post_ra>
